<compile_context>
chip_gen: v5e
topology: v5e:2x2
jax: 0.10.0
libtpu: 0.0.40
codegen_flags: <defaults>
</compile_context>

<pallas_src>
import functools

import jax
import jax.numpy as jnp
from jax.experimental import pallas as pl
from jax.experimental.pallas import tpu as pltpu


def _round_up(x, m):
    return (x + m - 1) // m * m


def _qmix_kernel(x_ref, wcat_ref, w22_ref, bb22_ref, out_ref,
                 *, n_agents, state_shape, hp):
    A, S, Hp = n_agents, state_shape, hp

    x = x_ref[...]                 # (TB, S + A + 1), matmul dtype (bf16 or f32)
    wcat = wcat_ref[...]           # (S + A + 1, (A + 3) * Hp), same dtype

    # --- one fused hyper-network matmul (biases folded via the ones column) ---
    raw = jnp.dot(x, wcat, preferred_element_type=jnp.float32)  # (TB,(A+3)*Hp) f32

    w1 = jnp.abs(raw[:, :A * Hp])                                # |hyper_w1|
    b1 = raw[:, A * Hp:(A + 1) * Hp]                             # hyper_b1
    w2 = jnp.abs(raw[:, (A + 1) * Hp:(A + 2) * Hp])              # |hyper_w2|
    h_b2 = jnp.maximum(raw[:, (A + 2) * Hp:(A + 3) * Hp], 0.0)   # relu(hyper_b2[0])

    # --- bmm(q(.,1,A), w1(.,A,H)) as a short unrolled agent sum (VPU) ---
    q = x[:, S:S + A].astype(jnp.float32)                        # (TB, A) f32
    hidden = b1
    for a in range(A):
        hidden = hidden + q[:, a:a + 1] * w1[:, a * Hp:(a + 1) * Hp]
    # ELU: keep it a select (the exp on the discarded branch is harmless).
    hidden = jnp.where(hidden > 0, hidden, jnp.exp(hidden) - 1.0)  # (TB, Hp)

    # --- q_total = hidden . w2  +  relu_hidden . wb2_2  +  bb2_2 ---
    contrib = hidden * w2 + h_b2 * w22_ref[...]                  # (TB, Hp) f32
    # Lane reduction expressed as ones(1,Hp) @ contrib^T so the per-row scalars
    # land lane-dense as (1, TB): the output store is an unmasked full-lane vst.
    ones_row = jnp.ones((1, Hp), dtype=jnp.float32)
    q_tot = jax.lax.dot_general(
        ones_row, contrib,
        dimension_numbers=(((1,), (1,)), ((), ())),
        preferred_element_type=jnp.float32)                      # (1, TB)
    out_ref[...] = (q_tot + bb22_ref[...]).astype(out_ref.dtype)


def pack_params(params, *, n_agents, qmix_hidden, state_shape,
                matmul_dtype=jnp.bfloat16):
    """Pack the state-side hyper layers into one fused, lane-aligned weight.

    wcat has shape (S + A + 1, (A + 3) * Hp) with Hp = round_up(H, 128):
      cols [a*Hp, a*Hp+H)      : hyper_w1 weights of agent a   (a = 0..A-1)
      cols [A*Hp, ...+H)       : hyper_b1
      cols [(A+1)*Hp, ...+H)   : hyper_w2
      cols [(A+2)*Hp, ...+H)   : hyper_b2 first linear
    Rows 0..S-1 multiply the states part of x, rows S..S+A-1 (the q columns of
    x) are zero, and the last row (the ones column of x) carries the biases.
    All padded lanes are zero, so they contribute exactly 0 downstream.
    """
    A, H, S = n_agents, qmix_hidden, state_shape
    Hp = _round_up(H, 128)
    din = S + A + 1
    bias_row = S + A
    wcat = jnp.zeros((din, (A + 3) * Hp), jnp.float32)

    def put(wc, col0, w, b):
        width = w.shape[1]
        wc = wc.at[:S, col0:col0 + width].set(w.astype(jnp.float32))
        wc = wc.at[bias_row, col0:col0 + width].set(
            b.reshape(-1).astype(jnp.float32))
        return wc

    ww1 = params["ww1"].reshape(S, A, H)
    bw1 = params["bw1"].reshape(A, H)
    for a in range(A):
        wcat = put(wcat, a * Hp, ww1[:, a, :], bw1[a])
    wcat = put(wcat, A * Hp, params["wb1"], params["bb1"])
    wcat = put(wcat, (A + 1) * Hp, params["ww2"], params["bw2"])
    wcat = put(wcat, (A + 2) * Hp, params["wb2_1"], params["bb2_1"])

    w22_row = jnp.zeros((1, Hp), jnp.float32).at[0, :H].set(
        params["wb2_2"].reshape(-1).astype(jnp.float32))
    bb22 = params["bb2_2"].reshape(1, 1).astype(jnp.float32)
    return wcat.astype(matmul_dtype), w22_row, bb22, Hp


def qmix_forward(q_values, states, params, *, n_agents, qmix_hidden,
                 batch_tile=256, matmul_dtype=jnp.bfloat16):
    """q_values: (E, T, A), states: (E, T, S) -> q_total: (E, T, 1)."""
    E, T, A = q_values.shape
    assert A == n_agents
    S = states.shape[-1]
    B = E * T
    assert batch_tile % 128 == 0, "batch_tile must be a multiple of 128"

    wcat, w22_row, bb22, Hp = pack_params(
        params, n_agents=A, qmix_hidden=qmix_hidden, state_shape=S,
        matmul_dtype=matmul_dtype)
    din = S + A + 1

    # Packed lane-dense input [states | q | 1]; pad the batch to a tile multiple.
    x = jnp.concatenate(
        [states.reshape(B, S).astype(jnp.float32),
         q_values.reshape(B, A).astype(jnp.float32),
         jnp.ones((B, 1), jnp.float32)], axis=-1)
    b_pad = _round_up(B, batch_tile)
    if b_pad != B:
        x = jnp.pad(x, ((0, b_pad - B), (0, 0)))
    x = x.astype(matmul_dtype)

    kernel = functools.partial(_qmix_kernel, n_agents=A, state_shape=S, hp=Hp)

    out = pl.pallas_call(
        kernel,
        out_shape=jax.ShapeDtypeStruct((1, b_pad), jnp.float32),
        grid_spec=pltpu.PrefetchScalarGridSpec(
            num_scalar_prefetch=0,
            grid=(b_pad // batch_tile,),
            in_specs=[
                pl.BlockSpec((batch_tile, din), lambda i: (i, 0)),
                pl.BlockSpec(wcat.shape, lambda i: (0, 0)),     # resident weights
                pl.BlockSpec(w22_row.shape, lambda i: (0, 0)),
                pl.BlockSpec(bb22.shape, lambda i: (0, 0)),
            ],
            out_specs=pl.BlockSpec((1, batch_tile), lambda i: (0, i)),
        ),
        compiler_params=pltpu.CompilerParams(
            # Independent rows -> shard the grid across both TCs on v7x.
            dimension_semantics=("parallel",),
            vmem_limit_bytes=32 * 1024 * 1024,
        ),
    )(x, wcat, w22_row, bb22)

    return out[0, :B].reshape(E, T, 1)


def init_params(key, state_shape, n_agents, qmix_hidden):
    """Deterministic synthetic init. Weights stored (in_features, out_features)."""
    keys = jax.random.split(key, 10)

    def lin(k, fin, fout, scale=0.1):
        kw, kb = jax.random.split(k)
        return (jax.random.normal(kw, (fin, fout), jnp.float32) * scale,
                jax.random.normal(kb, (1, fout), jnp.float32) * scale)

    ww1, bw1 = lin(keys[0], state_shape, n_agents * qmix_hidden)
    wb1, bb1 = lin(keys[1], state_shape, qmix_hidden)
    ww2, bw2 = lin(keys[2], state_shape, qmix_hidden)
    wb2_1, bb2_1 = lin(keys[3], state_shape, qmix_hidden)
    wb2_2, bb2_2 = lin(keys[4], qmix_hidden, 1)
    # TODO(synk): two_hyper_layers=True variant (extra hyper-hidden layer) not wired in.
    return dict(ww1=ww1, bw1=bw1, wb1=wb1, bb1=bb1, ww2=ww2, bw2=bw2,
                wb2_1=wb2_1, bb2_1=bb2_1, wb2_2=wb2_2, bb2_2=bb2_2)


def qmix_reference(q_values, states, p):
    """Pure-JAX reference mirroring the PyTorch forward."""
    E, T, A = q_values.shape
    S = states.shape[-1]
    q = q_values.reshape(-1, 1, A)
    s = states.reshape(-1, S)
    H = p["wb1"].shape[1]
    w1 = jnp.abs(s @ p["ww1"] + p["bw1"]).reshape(-1, A, H)
    b1 = (s @ p["wb1"] + p["bb1"]).reshape(-1, 1, H)
    hidden = jax.nn.elu(jnp.einsum("bij,bjk->bik", q, w1) + b1)
    w2 = jnp.abs(s @ p["ww2"] + p["bw2"]).reshape(-1, H, 1)
    b2 = (jnp.maximum(s @ p["wb2_1"] + p["bb2_1"], 0.0) @ p["wb2_2"]
          + p["bb2_2"]).reshape(-1, 1, 1)
    q_total = jnp.einsum("bij,bjk->bik", hidden, w2) + b2
    return q_total.reshape(E, -1, 1)


if __name__ == "__main__":
    # Small shapes consistent with the module's forward.
    episode_num, max_episode_len = 2, 8
    n_agents, qmix_hidden, state_shape = 4, 32, 32

    key = jax.random.PRNGKey(0)
    k_q, k_s, k_p = jax.random.split(key, 3)
    q_values = jax.random.normal(
        k_q, (episode_num, max_episode_len, n_agents), jnp.float32)
    states = jax.random.normal(
        k_s, (episode_num, max_episode_len, state_shape), jnp.float32)
    params = init_params(k_p, state_shape, n_agents, qmix_hidden)

    ref = qmix_reference(q_values, states, params)

    # 1) f32 MXU operands: structural/numerical check. Tolerance leaves margin
    #    for a possibly reduced-precision f32 lowering of the fused matmul /
    #    final MXU reduction on some TPU generations.
    out_f32 = qmix_forward(q_values, states, params, n_agents=n_agents,
                           qmix_hidden=qmix_hidden, batch_tile=128,
                           matmul_dtype=jnp.float32)
    out_f32 = jax.block_until_ready(out_f32)
    assert out_f32.shape == (episode_num, max_episode_len, 1)
    assert jnp.allclose(out_f32, ref, atol=5e-2, rtol=1e-2)

    # 2) Recommended fast config: bf16 MXU operands (f32 accumulation and f32
    #    elementwise math). Tolerance covers bf16 input quantization error.
    out_bf16 = qmix_forward(q_values, states, params, n_agents=n_agents,
                            qmix_hidden=qmix_hidden, batch_tile=256,
                            matmul_dtype=jnp.bfloat16)
    out_bf16 = jax.block_until_ready(out_bf16)
    assert out_bf16.shape == (episode_num, max_episode_len, 1)
    assert jnp.allclose(out_bf16, ref, atol=2.5e-1, rtol=5e-2)

    # 3) Padding / multi-tile grid path: B = 300 -> padded to 512, grid = 2.
    E2, T2 = 5, 60
    kq2, ks2 = jax.random.split(jax.random.PRNGKey(1))
    qv2 = jax.random.normal(kq2, (E2, T2, n_agents), jnp.float32)
    st2 = jax.random.normal(ks2, (E2, T2, state_shape), jnp.float32)
    out2 = qmix_forward(qv2, st2, params, n_agents=n_agents,
                        qmix_hidden=qmix_hidden, batch_tile=256,
                        matmul_dtype=jnp.bfloat16)
    out2 = jax.block_until_ready(out2)
    ref2 = qmix_reference(qv2, st2, params)
    assert out2.shape == (E2, T2, 1)
    assert jnp.allclose(out2, ref2, atol=2.5e-1, rtol=5e-2)

    print("KERNEL_OK")
</pallas_src>

<mosaic_0001>
module attributes {stable_mosaic.version = 11 : i64} {
  func.func @_qmix_kernel(%arg0: i32, %arg1: memref<128x37xf32, #tpu.memory_space<vmem>>, %arg2: memref<37x896xf32, #tpu.memory_space<vmem>>, %arg3: memref<1x128xf32, #tpu.memory_space<vmem>>, %arg4: memref<1x1xf32, #tpu.memory_space<vmem>>, %arg5: memref<1x128xf32, #tpu.memory_space<vmem>>) attributes {dimension_semantics = [#tpu.dimension_semantics<parallel>], iteration_bounds = array<i64: 1>, scalar_prefetch = 0 : i64, scratch_operands = 0 : i64, tpu.core_type = #tpu.core_type<tc>, window_params = [{transform_indices = @transform_0, window_bounds = array<i64: 128, 37>}, {pipeline_mode = #tpu.pipeline_mode<synchronous>, transform_indices = @transform_1, window_bounds = array<i64: 37, 896>}, {pipeline_mode = #tpu.pipeline_mode<synchronous>, transform_indices = @transform_2, window_bounds = array<i64: 1, 128>}, {pipeline_mode = #tpu.pipeline_mode<synchronous>, transform_indices = @transform_3, window_bounds = array<i64: 1, 1>}, {transform_indices = @transform_4, window_bounds = array<i64: 1, 128>}]} {
    %c0 = arith.constant 0 : index
    %c0_0 = arith.constant 0 : index
    %0 = vector.load %arg1[%c0, %c0_0] : memref<128x37xf32, #tpu.memory_space<vmem>>, vector<128x37xf32>
    %c0_1 = arith.constant 0 : index
    %c0_2 = arith.constant 0 : index
    %1 = vector.load %arg2[%c0_1, %c0_2] : memref<37x896xf32, #tpu.memory_space<vmem>>, vector<37x896xf32>
    %cst = arith.constant dense<0.000000e+00> : vector<128x896xf32>
    %2 = tpu.matmul %0, %1, %cst {dimension_numbers = #tpu.dot_dimension_numbers<[1], [0], [0], [1], [0, 0, 1, 1], [], []>} : vector<128x37xf32>, vector<37x896xf32>, vector<128x896xf32> -> vector<128x896xf32>
    %3 = vector.extract_strided_slice %2 {offsets = [0, 0], sizes = [128, 512], strides = [1, 1]} : vector<128x896xf32> to vector<128x512xf32>
    %4 = math.absf %3 : vector<128x512xf32>
    %5 = vector.extract_strided_slice %2 {offsets = [0, 512], sizes = [128, 128], strides = [1, 1]} : vector<128x896xf32> to vector<128x128xf32>
    %6 = vector.extract_strided_slice %2 {offsets = [0, 640], sizes = [128, 128], strides = [1, 1]} : vector<128x896xf32> to vector<128x128xf32>
    %7 = math.absf %6 : vector<128x128xf32>
    %8 = vector.extract_strided_slice %2 {offsets = [0, 768], sizes = [128, 128], strides = [1, 1]} : vector<128x896xf32> to vector<128x128xf32>
    %cst_3 = arith.constant 0.000000e+00 : f32
    %9 = vector.broadcast %cst_3 : f32 to vector<128x128xf32>
    %10 = arith.maximumf %8, %9 : vector<128x128xf32>
    %11 = vector.extract_strided_slice %0 {offsets = [0, 32], sizes = [128, 4], strides = [1, 1]} : vector<128x37xf32> to vector<128x4xf32>
    %12 = vector.extract_strided_slice %11 {offsets = [0, 0], sizes = [128, 1], strides = [1, 1]} : vector<128x4xf32> to vector<128x1xf32>
    %13 = vector.extract_strided_slice %4 {offsets = [0, 0], sizes = [128, 128], strides = [1, 1]} : vector<128x512xf32> to vector<128x128xf32>
    %14 = vector.broadcast %12 : vector<128x1xf32> to vector<128x128xf32>
    %15 = arith.mulf %14, %13 : vector<128x128xf32>
    %16 = arith.addf %5, %15 : vector<128x128xf32>
    %17 = vector.extract_strided_slice %11 {offsets = [0, 1], sizes = [128, 1], strides = [1, 1]} : vector<128x4xf32> to vector<128x1xf32>
    %18 = vector.extract_strided_slice %4 {offsets = [0, 128], sizes = [128, 128], strides = [1, 1]} : vector<128x512xf32> to vector<128x128xf32>
    %19 = vector.broadcast %17 : vector<128x1xf32> to vector<128x128xf32>
    %20 = arith.mulf %19, %18 : vector<128x128xf32>
    %21 = arith.addf %16, %20 : vector<128x128xf32>
    %22 = vector.extract_strided_slice %11 {offsets = [0, 2], sizes = [128, 1], strides = [1, 1]} : vector<128x4xf32> to vector<128x1xf32>
    %23 = vector.extract_strided_slice %4 {offsets = [0, 256], sizes = [128, 128], strides = [1, 1]} : vector<128x512xf32> to vector<128x128xf32>
    %24 = vector.broadcast %22 : vector<128x1xf32> to vector<128x128xf32>
    %25 = arith.mulf %24, %23 : vector<128x128xf32>
    %26 = arith.addf %21, %25 : vector<128x128xf32>
    %27 = vector.extract_strided_slice %11 {offsets = [0, 3], sizes = [128, 1], strides = [1, 1]} : vector<128x4xf32> to vector<128x1xf32>
    %28 = vector.extract_strided_slice %4 {offsets = [0, 384], sizes = [128, 128], strides = [1, 1]} : vector<128x512xf32> to vector<128x128xf32>
    %29 = vector.broadcast %27 : vector<128x1xf32> to vector<128x128xf32>
    %30 = arith.mulf %29, %28 : vector<128x128xf32>
    %31 = arith.addf %26, %30 : vector<128x128xf32>
    %cst_4 = arith.constant 0.000000e+00 : f32
    %32 = vector.broadcast %cst_4 : f32 to vector<128x128xf32>
    %33 = arith.cmpf ogt, %31, %32 : vector<128x128xf32>
    %34 = math.exp %31 : vector<128x128xf32>
    %cst_5 = arith.constant 1.000000e+00 : f32
    %35 = vector.broadcast %cst_5 : f32 to vector<128x128xf32>
    %36 = arith.subf %34, %35 : vector<128x128xf32>
    %37 = arith.select %33, %31, %36 : vector<128x128xi1>, vector<128x128xf32>
    %38 = arith.mulf %37, %7 : vector<128x128xf32>
    %c0_6 = arith.constant 0 : index
    %c0_7 = arith.constant 0 : index
    %39 = vector.load %arg3[%c0_6, %c0_7] : memref<1x128xf32, #tpu.memory_space<vmem>>, vector<1x128xf32>
    %40 = vector.broadcast %39 : vector<1x128xf32> to vector<128x128xf32>
    %41 = arith.mulf %10, %40 : vector<128x128xf32>
    %42 = arith.addf %38, %41 : vector<128x128xf32>
    %cst_8 = arith.constant 1.000000e+00 : f32
    %43 = vector.broadcast %cst_8 : f32 to vector<1x128xf32>
    %cst_9 = arith.constant dense<0.000000e+00> : vector<1x128xf32>
    %44 = tpu.matmul %43, %42, %cst_9 {dimension_numbers = #tpu.dot_dimension_numbers<[1], [1], [0], [0], [0, 0, 1, 0], [], []>} : vector<1x128xf32>, vector<128x128xf32>, vector<1x128xf32> -> vector<1x128xf32>
    %c0_10 = arith.constant 0 : index
    %c0_11 = arith.constant 0 : index
    %45 = vector.load %arg4[%c0_10, %c0_11] : memref<1x1xf32, #tpu.memory_space<vmem>>, vector<1x1xf32>
    %46 = vector.broadcast %45 : vector<1x1xf32> to vector<1x128xf32>
    %47 = arith.addf %44, %46 : vector<1x128xf32>
    %c0_12 = arith.constant 0 : index
    %c0_13 = arith.constant 0 : index
    %48 = vector.load %arg5[%c0_12, %c0_13] : memref<1x128xf32, #tpu.memory_space<vmem>>, vector<1x128xf32>
    tpu.vector_store %arg5[%c0_12, %c0_13], %47 {strides = array<i32>} : memref<1x128xf32, #tpu.memory_space<vmem>>, vector<1x128xf32>,
    return
  }
  func.func @transform_0(%arg0: i32) -> (i32, i32) {
    %c0_i32 = arith.constant 0 : i32
    %c0_i32_0 = arith.constant 0 : i32
    return %arg0, %c0_i32 : i32, i32
  }
  func.func @transform_1(%arg0: i32) -> (i32, i32) {
    %c0_i32 = arith.constant 0 : i32
    %c0_i32_0 = arith.constant 0 : i32
    %c0_i32_1 = arith.constant 0 : i32
    return %c0_i32, %c0_i32_0 : i32, i32
  }
  func.func @transform_2(%arg0: i32) -> (i32, i32) {
    %c0_i32 = arith.constant 0 : i32
    %c0_i32_0 = arith.constant 0 : i32
    %c0_i32_1 = arith.constant 0 : i32
    return %c0_i32, %c0_i32_0 : i32, i32
  }
  func.func @transform_3(%arg0: i32) -> (i32, i32) {
    %c0_i32 = arith.constant 0 : i32
    %c0_i32_0 = arith.constant 0 : i32
    %c0_i32_1 = arith.constant 0 : i32
    return %c0_i32, %c0_i32_0 : i32, i32
  }
  func.func @transform_4(%arg0: i32) -> (i32, i32) {
    %c0_i32 = arith.constant 0 : i32
    %c0_i32_0 = arith.constant 0 : i32
    return %c0_i32, %arg0 : i32, i32
  }
}

</mosaic_0001>

<bundles_post_ra>
// kernel: tpu_custom_call.1
= control target key start
LH: loop header
LB: loop body
LE: loop exit
PB: predicated region body
PF: predicated region fallthrough
CT: control target
= control target key end

     0   :  { %s2518_s0 = inlined_call_operand.vmem [shape: f32[128,37], index: 0, kind: input, shape index: {}]   ;;  %s2519_s1 = inlined_call_operand.hbm [shape: f32[37,896], index: 1, kind: input, shape index: {}]   ;;  %s2520_s2 = inlined_call_operand.vmem [shape: f32[1,128], index: 2, kind: input, shape index: {}]   ;;  %s2521_s3 = inlined_call_operand.<no memory space> [shape: f32[1,1], index: 3, kind: input, shape index: {}]   ;;  %s2522_s4 = inlined_call_operand.hbm [shape: f32[1,128], index: 4, kind: output, shape index: {}]  }
   0x1   :  { %v9_v0 = vstv %s2521_s3 }
   0x2   :  { %10 = vst [vmem:[#allocation2] sm:$0x1] %v9_v0 }
   0x3   :  { %11 = vsyncpa [#allocation4], 0 }
   0x4   :  { %12 = vsyncpa [#allocation5], 0  ;;  %s19_s19 = sshll.u32 %s2519_s1, 4  ;;  %s1543_s20 = smov [#allocation3]   ;;  %s20_s19 = int_to_ptr.hbm [resolvable:$true] %s19_s19 }
   0x5   :  { %s21_s21 = sshll.u32 %s1543_s20, 4  ;;  %s1544_s22 = smov 896   ;;  %s22_s21 = int_to_ptr.vmem [resolvable:$true] %s21_s21 }
   0x6   :  { %s1545_s23 = smov 56  }
   0x7   :  { %27 = dma.hbm_to_vmem [thread:$0]  %s20_s19, 4480, %s22_s21, [#allocation4], %s1544_s22, %s1544_s22, %s1545_s23  }
   0x8   :  { %1539 = dma.done.wait [#allocation4], 4480  }
   0x9   :  { %1540 = vsyncadd [#allocation4], 4294962816  ;;  %v1546_v1 = vmov 32   ;;  %vm136_vm0 = vcmask 1044480   ;;  %v80_v2 = vld [vmem:[#allocation3 + $0xe0] sm:$0x1f] }
   0xa   :  { %1432 = vset.pattern.permute.xlu2 %v1546_v1  ;;  %1431 = vset.pattern.permute.xlu1 %v1546_v1  ;;  %v1587_v3 = vld [vmem:[%s2518_s0 + $0x20] sm:$0xff]  ;;  %v1592_v4 = vld [vmem:[%s2518_s0 + $0x10] sm:$0xff]  ;;  %v81_v12 = vld [vmem:[#allocation3 + $0xe8] sm:$0x1f]  ;;  %vm87_vm1 = vcmask 302080   ;;  %v1547_v33 = vmov 33  }
   0xb   :  { %1430 = vset.pattern.permute.xlu0 %v1546_v1  ;;  %1270 = vmatpush.msk.msra.mxu0 %vm136_vm0, %v80_v2  ;;  %v1599_v5 = vld [vmem:[%s2518_s0] sm:$0xff]  ;;  %v73_v6 = vld [vmem:[#allocation3 + $0xa8] sm:$0xff]  ;;  %v66_v7 = vld [vmem:[#allocation3 + $0x70] sm:$0xff]  ;;  %v2524_v37 = vmov 35   ;;  %v2523_v42 = vmov 34   ;;  %s1260_s30 = sshll.u32 %s2522_s4, 4  ;;  %s1261_s30 = int_to_ptr.hbm [resolvable:$true] %s1260_s30 }
   0xc   :  { %726 = vperm.xlu2 %1432, %v1587_v3   ;;  %718 = vperm.xlu1 %1431, %v1592_v4   ;;  %v1603_v8 = vld [vmem:[#allocation3 + $0xf0] sm:$0x1f]  ;;  %v59_v9 = vld [vmem:[#allocation3 + $0x38] sm:$0xff]  ;;  %v1610_v11 = vld [vmem:[#allocation3 + $0x80] sm:$0xff] }
   0xd   :  { %710 = vperm.xlu0 %1430, %v1599_v5   ;;  %170 = vmatpush.msra.mxu0 %v73_v6  ;;  %v1608_v10 = vld [vmem:[#allocation3 + $0xb8] sm:$0xff]  ;;  %v52_v13 = vld [vmem:[#allocation3] sm:$0xff]  ;;  %v74_v15 = vld [vmem:[#allocation3 + $0xb0] sm:$0xff] }
   0xe   :  { %1405 = vmatpush.msk.msra.mxu3 %vm136_vm0, %v80_v2  ;;  %1304 = vmatpush.msk.msra.mxu2 %vm136_vm0, %v1603_v8  ;;  %v1615_v14 = vld [vmem:[%s2518_s0 + $0x28] sm:$0xff]  ;;  %v1622_v16 = vld [vmem:[%s2518_s0 + $0x18] sm:$0xff]  ;;  %v1643_v23 = vld [vmem:[%s2518_s0 + $0x40] sm:$0xff] }
   0xf   :  { %171 = vmatpush.msra.mxu0 %v66_v7  ;;  %1287 = vmatpush.msk.msra.mxu1 %vm136_vm0, %v81_v12  ;;  %v1627_v17 = vld [vmem:[%s2518_s0 + $0x8] sm:$0xff]  ;;  %v67_v19 = vld [vmem:[#allocation3 + $0x78] sm:$0xff]  ;;  %v54_v20 = vld [vmem:[#allocation3 + $0x10] sm:$0xff] }
  0x10   :  { %1406 = vmatpush.msra.mxu3 %v73_v6  ;;  %300 = vmatpush.msra.mxu2 %v1608_v10  ;;  %v61_v18 = vld [vmem:[#allocation3 + $0x48] sm:$0xff]  ;;  %v60_v22 = vld [vmem:[#allocation3 + $0x40] sm:$0xff]  ;;  %v1650_v25 = vld [vmem:[%s2518_s0 + $0x38] sm:$0xff] }
  0x11   :  { %172 = vmatpush.msra.mxu0 %v59_v9  ;;  %235 = vmatpush.msra.mxu1 %v74_v15  ;;  %v1638_v21 = vld [vmem:[%s2518_s0 + $0x68] sm:$0xff]  ;;  %v1655_v26 = vld [vmem:[%s2518_s0 + $0x30] sm:$0xff]  ;;  %v1675_v28 = vld [vmem:[%s2518_s0 + $0x58] sm:$0xff] }
  0x12   :  { %1407 = vmatpush.msra.mxu3 %v66_v7  ;;  %301 = vmatpush.msra.mxu2 %v1610_v11  ;;  %v53_v24 = vld [vmem:[#allocation3 + $0x8] sm:$0xff]  ;;  %v1701_v31 = vld [vmem:[%s2518_s0 + $0x78] sm:$0xff]  ;;  %v1710_v32 = vld [vmem:[%s2518_s0 + $0x60] sm:$0xff] }
  0x13   :  { %173 = vmatpush.msra.mxu0 %v52_v13  ;;  %236 = vmatpush.msra.mxu1 %v67_v19  ;;  %v1670_v27 = vld [vmem:[%s2518_s0 + $0x70] sm:$0xff]  ;;  %v1687_v30 = vld [vmem:[%s2518_s0 + $0x48] sm:$0xff]  ;;  %v84_v34 = vld [vmem:[#allocation3 + $0x100] sm:$0x1f] }
  0x14   :  { %730 = vperm.xlu2 %1432, %v1615_v14   ;;  %722 = vperm.xlu1 %1431, %v1622_v16   ;;  %v1682_v29 = vld [vmem:[%s2518_s0 + $0x50] sm:$0xff]  ;;  %v83_v35 = vld [vmem:[#allocation3 + $0xf8] sm:$0x1f]  ;;  %v76_v36 = vld [vmem:[#allocation3 + $0xc0] sm:$0xff] }
  0x15   :  { %714 = vperm.xlu0 %1430, %v1627_v17   ;;  %1271 = vmatmul.msk.f32.vlgmr.msra.gmra.mxu0 %vm87_vm1, %v1599_v5  ;;  %v69_v38 = vld [vmem:[#allocation3 + $0x88] sm:$0xff]  ;;  %v62_v39 = vld [vmem:[#allocation3 + $0x50] sm:$0xff]  ;;  %v55_v41 = vld [vmem:[#allocation3 + $0x18] sm:$0xff] }
  0x16   :  { %302 = vmatpush.msra.mxu2 %v61_v18  ;;  %1408 = vmatpush.msra.mxu3 %v59_v9  ;;  %v86_v40 = vld [vmem:[#allocation3 + $0x110] sm:$0x1f]  ;;  %v85_v43 = vld [vmem:[#allocation3 + $0x108] sm:$0x1f]  ;;  %v79_v45 = vld [vmem:[#allocation3 + $0xd8] sm:$0xff] }
  0x17   :  { %237 = vmatpush.msra.mxu1 %v60_v22  ;;  %1338 = vmatpush.msk.msrb.mxu0 %vm136_vm0, %v84_v34  ;;  %v77_v44 = vld [vmem:[#allocation3 + $0xc8] sm:$0xff]  ;;  %v70_v46 = vld [vmem:[#allocation3 + $0x90] sm:$0xff]  ;;  %v63_v47 = vld [vmem:[#allocation3 + $0x58] sm:$0xff] }
  0x18   :  { %303 = vmatpush.msra.mxu2 %v54_v20  ;;  %1409 = vmatpush.msra.mxu3 %v52_v13  ;;  %v56_v48 = vld [vmem:[#allocation3 + $0x20] sm:$0xff]  ;;  %v78_v49 = vld [vmem:[#allocation3 + $0xd0] sm:$0xff]  ;;  %v65_v52 = vld [vmem:[#allocation3 + $0x68] sm:$0xff] }
  0x19   :  { %1305 = vmatmul.msk.f32.vlgmr.msra.gmra.mxu2 %vm87_vm1, %v1599_v5  ;;  %1284 = vmatmul.msk.f32.vlgmr.msra.gmra.mxu3 %vm87_vm1, %v1638_v21  ;;  %v72_v50 = vld [vmem:[#allocation3 + $0xa0] sm:$0xff]  ;;  %v58_v53 = vld [vmem:[#allocation3 + $0x30] sm:$0xff]  ;;  %v71_v54 = vld [vmem:[#allocation3 + $0x98] sm:$0xff] }
  0x1a   :  { %1410 = vmatpush.msk.msrb.mxu3 %vm136_vm0, %v81_v12  ;;  %238 = vmatpush.msra.mxu1 %v53_v24  ;;  %v64_v55 = vld [vmem:[#allocation3 + $0x60] sm:$0xff]  ;;  %v57_v57 = vld [vmem:[#allocation3 + $0x28] sm:$0xff] }
  0x1b   :  { %1288 = vmatmul.msk.f32.vlgmr.msra.gmra.mxu1 %vm87_vm1, %v1599_v5  ;;  %1372 = vmatpush.msk.msrb.mxu2 %vm136_vm0, %v86_v40 }
  0x1c   :  { %742 = vperm.xlu2 %1432, %v1643_v23   ;;  %738 = vperm.xlu1 %1431, %v1650_v25  }
  0x1d   :  { %734 = vperm.xlu0 %1430, %v1655_v26   ;;  %1272 = vmatmul.msk.f32.gmra.mxu0 %vm87_vm1, %v1627_v17 }
  0x1e   :  { %1411 = vmatpush.msrb.mxu3 %v74_v15  ;;  %1355 = vmatpush.msk.msrb.mxu1 %vm136_vm0, %v85_v43 }
  0x1f   :  { %430 = vmatpush.msrb.mxu0 %v77_v44  ;;  %560 = vmatpush.msrb.mxu2 %v79_v45 }
  0x20   :  { %1412 = vmatpush.msrb.mxu3 %v67_v19  ;;  %495 = vmatpush.msrb.mxu1 %v78_v49 }
  0x21   :  { %1306 = vmatmul.msk.f32.gmra.mxu2 %vm87_vm1, %v1627_v17  ;;  %1285 = vmatmul.msk.f32.gmra.mxu3 %vm87_vm1, %v1670_v27 }
  0x22   :  { %1413 = vmatpush.msrb.mxu3 %v60_v22  ;;  %431 = vmatpush.msrb.mxu0 %v70_v46 }
  0x23   :  { %1289 = vmatmul.msk.f32.gmra.mxu1 %vm87_vm1, %v1627_v17  ;;  %561 = vmatpush.msrb.mxu2 %v72_v50 }
  0x24   :  { %754 = vperm.xlu2 %1432, %v1675_v28   ;;  %750 = vperm.xlu1 %1431, %v1682_v29  }
  0x25   :  { %746 = vperm.xlu0 %1430, %v1687_v30   ;;  %1273 = vmatmul.msk.f32.gmra.mxu0 %vm87_vm1, %v1592_v4 }
  0x26   :  { %1414 = vmatpush.msrb.mxu3 %v53_v24  ;;  %432 = vmatpush.msrb.mxu0 %v63_v47 }
  0x27   :  { %562 = vmatpush.msrb.mxu2 %v65_v52  ;;  %496 = vmatpush.msrb.mxu1 %v71_v54 }
  0x28   :  { %1415 = vmatpush.msk.msra.mxu3 %vm136_vm0, %v1603_v8  ;;  %433 = vmatpush.msrb.mxu0 %v56_v48 }
  0x29   :  { %1307 = vmatmul.msk.f32.gmra.mxu2 %vm87_vm1, %v1592_v4  ;;  %1286 = vmatmul.msk.f32.gmra.mxu3 %vm87_vm1, %v1701_v31 }
  0x2a   :  { %1416 = vmatpush.msra.mxu3 %v1608_v10  ;;  %563 = vmatpush.msrb.mxu2 %v58_v53 }
  0x2b   :  { %1290 = vmatmul.msk.f32.gmra.mxu1 %vm87_vm1, %v1592_v4 }
  0x2c   :  { %766 = vperm.xlu2 %1432, %v1670_v27   ;;  %762 = vperm.xlu1 %1431, %v1638_v21  }
  0x2d   :  { %758 = vperm.xlu0 %1430, %v1710_v32   ;;  %1274 = vmatmul.msk.f32.gmra.mxu0 %vm87_vm1, %v1622_v16 }
  0x2e   :  { %1417 = vmatpush.msra.mxu3 %v1610_v11  ;;  %497 = vmatpush.msrb.mxu1 %v64_v55 }
  0x30   :  { %1418 = vmatpush.msra.mxu3 %v61_v18  ;;  %498 = vmatpush.msrb.mxu1 %v57_v57 }
  0x31   :  { %1308 = vmatmul.msk.f32.gmra.mxu2 %vm87_vm1, %v1622_v16  ;;  %1301 = vmatmul.msk.f32.vlgmr.msrb.gmra.mxu3 %vm87_vm1, %v1638_v21 }
  0x32   :  { %1419 = vmatpush.msra.mxu3 %v54_v20 }
  0x33   :  { %1291 = vmatmul.msk.f32.gmra.mxu1 %vm87_vm1, %v1622_v16 }
  0x34   :  { %1434 = vset.pattern.permute.xlu2 %v1547_v33  ;;  %1433 = vset.pattern.permute.xlu1 %v1547_v33 }
  0x35   :  { %770 = vperm.xlu0 %1430, %v1701_v31   ;;  %810 = vperm.xlu2 %1434, %v1627_v17  }
  0x36   :  { %806 = vperm.xlu1 %1433, %v1599_v5   ;;  %1275 = vmatmul.msk.f32.gmra.mxu0 %vm87_vm1, %v1587_v3 }
  0x37   :  { %1321 = vmatpush.msk.msrb.mxu3 %vm136_vm0, %v83_v35 }
  0x39   :  { %1309 = vmatmul.msk.f32.gmra.mxu2 %vm87_vm1, %v1587_v3  ;;  %1302 = vmatmul.msk.f32.gmra.mxu3 %vm87_vm1, %v1670_v27 }
  0x3a   :  { %365 = vmatpush.msrb.mxu3 %v76_v36 }
  0x3b   :  { %1292 = vmatmul.msk.f32.gmra.mxu1 %vm87_vm1, %v1587_v3 }
  0x3c   :  { %366 = vmatpush.msrb.mxu3 %v69_v38 }
  0x3d   :  { %1438 = vset.pattern.permute.xlu0 %v2524_v37  ;;  %822 = vperm.xlu2 %1434, %v1587_v3  }
  0x3e   :  { %818 = vperm.xlu1 %1433, %v1622_v16   ;;  %1054 = vperm.xlu0 %1438, %v1670_v27  }
  0x3f   :  { %1276 = vmatmul.msk.f32.gmra.mxu0 %vm87_vm1, %v1615_v14  ;;  %367 = vmatpush.msrb.mxu3 %v62_v39 }
  0x41   :  { %1310 = vmatmul.msk.f32.gmra.mxu2 %vm87_vm1, %v1615_v14  ;;  %1303 = vmatmul.msk.f32.gmra.mxu3 %vm87_vm1, %v1701_v31 }
  0x42   :  { %368 = vmatpush.msrb.mxu3 %v55_v41 }
  0x43   :  { %1293 = vmatmul.msk.f32.gmra.mxu1 %vm87_vm1, %v1615_v14 }
  0x45   :  { %866 = vperm.xlu2 %1434, %v1701_v31  }
  0x46   :  { %826 = vperm.xlu1 %1433, %v1615_v14   ;;  %1439 = vset.pattern.permute.xlu0 %v2523_v42 }
  0x47   :  { %1277 = vmatmul.msk.f32.gmra.mxu0 %vm87_vm1, %v1655_v26  ;;  %962 = vperm.xlu0 %1439, %v1701_v31  }
  0x49   :  { %1311 = vmatmul.msk.f32.gmra.mxu2 %vm87_vm1, %v1655_v26  ;;  %1318 = vmatmul.msk.f32.vlgmr.msra.gmra.mxu3 %vm87_vm1, %v1638_v21 }
  0x4b   :  { %1294 = vmatmul.msk.f32.gmra.mxu1 %vm87_vm1, %v1655_v26 }
  0x4d   :  { %1435 = vset.pattern.permute.xlu2 %v2524_v37 }
  0x4e   :  { %862 = vperm.xlu1 %1433, %v1670_v27   ;;  %1058 = vperm.xlu2 %1435, %v1701_v31  }
  0x4f   :  { %1278 = vmatmul.msk.f32.gmra.mxu0 %vm87_vm1, %v1650_v25  ;;  %942 = vperm.xlu0 %1439, %v1682_v29  }
  0x51   :  { %1312 = vmatmul.msk.f32.gmra.mxu2 %vm87_vm1, %v1650_v25  ;;  %1319 = vmatmul.msk.f32.gmra.mxu3 %vm87_vm1, %v1670_v27 }
  0x53   :  { %1295 = vmatmul.msk.f32.gmra.mxu1 %vm87_vm1, %v1650_v25 }
  0x56   :  { %1436 = vset.pattern.permute.xlu1 %v2523_v42  ;;  %1437 = vset.pattern.permute.xlu2 %v1547_v33 }
  0x57   :  { %1279 = vmatmul.msk.f32.gmra.mxu0 %vm87_vm1, %v1643_v23  ;;  %958 = vperm.xlu1 %1436, %v1670_v27  }
  0x58   :  { %1444 = vset.pattern.permute.xlu0 %v1547_v33  ;;  %858 = vperm.xlu2 %1437, %v1638_v21  }
  0x59   :  { %814 = vperm.xlu0 %1444, %v1592_v4   ;;  %1313 = vmatmul.msk.f32.gmra.mxu2 %vm87_vm1, %v1643_v23 }
  0x5a   :  { %1320 = vmatmul.msk.f32.gmra.mxu3 %vm87_vm1, %v1701_v31 }
  0x5b   :  { %1296 = vmatmul.msk.f32.gmra.mxu1 %vm87_vm1, %v1643_v23 }
  0x5f   :  { %1280 = vmatmul.msk.f32.gmra.mxu0 %vm87_vm1, %v1687_v30  ;;  %954 = vperm.xlu1 %1436, %v1638_v21  }
  0x60   :  { %854 = vperm.xlu2 %1437, %v1710_v32  }
  0x61   :  { %850 = vperm.xlu0 %1444, %v1675_v28   ;;  %1314 = vmatmul.msk.f32.gmra.mxu2 %vm87_vm1, %v1687_v30 }
  0x62   :  { %1322 = vmatmul.msk.f32.vlgmr.msrb.gmra.mxu3 %vm87_vm1, %v1599_v5 }
  0x63   :  { %1297 = vmatmul.msk.f32.gmra.mxu1 %vm87_vm1, %v1687_v30 }
  0x66   :  { %v1805_v51 = vpop.permute.xlu2 %726 }
  0x67   :  { %1281 = vmatmul.msk.f32.gmra.mxu0 %vm87_vm1, %v1682_v29  ;;  %1440 = vset.pattern.permute.xlu1 %v2524_v37 }
  0x68   :  { %1441 = vset.pattern.permute.xlu2 %v2523_v42  ;;  %1050 = vperm.xlu1 %1440, %v1638_v21  }
  0x69   :  { %830 = vperm.xlu0 %1444, %v1655_v26   ;;  %950 = vperm.xlu2 %1441, %v1710_v32  }
  0x6a   :  { %1315 = vmatmul.msk.f32.gmra.mxu2 %vm87_vm1, %v1682_v29  ;;  %1323 = vmatmul.msk.f32.gmra.mxu3 %vm87_vm1, %v1627_v17 }
  0x6b   :  { %1298 = vmatmul.msk.f32.gmra.mxu1 %vm87_vm1, %v1682_v29 }
  0x6e   :  { %v1820_v56 = vpop.permute.xlu2 %730 }
  0x6f   :  { %1282 = vmatmul.msk.f32.gmra.mxu0 %vm87_vm1, %v1675_v28 }
  0x70   :  { %1046 = vperm.xlu1 %1440, %v1710_v32  }
  0x71   :  { %1449 = vset.pattern.permute.xlu0 %v2524_v37  ;;  %946 = vperm.xlu2 %1441, %v1675_v28  }
  0x72   :  { %1034 = vperm.xlu0 %1449, %v1687_v30   ;;  %1316 = vmatmul.msk.f32.gmra.mxu2 %vm87_vm1, %v1675_v28 }
  0x73   :  { %1324 = vmatmul.msk.f32.gmra.mxu3 %vm87_vm1, %v1592_v4  ;;  %1299 = vmatmul.msk.f32.gmra.mxu1 %vm87_vm1, %v1675_v28 }
  0x76   :  { %v1834_v58 = vpop.permute.xlu2 %742 }
  0x77   :  { %1283 = vmatmul.msk.f32.gmra.mxu0 %vm87_vm1, %v1710_v32 }
  0x78   :  { %1442 = vset.pattern.permute.xlu1 %v1547_v33 }
  0x79   :  { %1443 = vset.pattern.permute.xlu2 %v2524_v37  ;;  %846 = vperm.xlu1 %1442, %v1682_v29  }
  0x7a   :  { %1018 = vperm.xlu0 %1449, %v1615_v14   ;;  %1042 = vperm.xlu2 %1443, %v1675_v28  }
  0x7b   :  { %1317 = vmatmul.msk.f32.gmra.mxu2 %vm87_vm1, %v1710_v32  ;;  %1325 = vmatmul.msk.f32.gmra.mxu3 %vm87_vm1, %v1622_v16 }
  0x7c   :  { %1300 = vmatmul.msk.f32.gmra.mxu1 %vm87_vm1, %v1710_v32 }
  0x7e   :  { %v1849_v59 = vpop.permute.xlu2 %754  ;;  %v1853_v60 = vpop.permute.xlu1 %718 }
  0x7f   :  { %2525 = vst [vmem:[#allocation9_spill] sm:$0xff] %v1849_v59  ;;  %1339 = vmatmul.msk.f32.vlgmr.msrb.gmra.mxu0 %vm87_vm1, %v1599_v5  ;;  %v1892_v2 = vpop.permute.xlu0 %710 }
  0x81   :  { %842 = vperm.xlu1 %1442, %v1687_v30  }
  0x82   :  { %1452 = vset.pattern.permute.xlu0 %v2523_v42  ;;  %1038 = vperm.xlu2 %1443, %v1682_v29  }
  0x83   :  { %910 = vperm.xlu0 %1452, %v1592_v4   ;;  %1373 = vmatmul.msk.f32.vlgmr.msrb.gmra.mxu2 %vm87_vm1, %v1599_v5 }
  0x84   :  { %1326 = vmatmul.msk.f32.gmra.mxu3 %vm87_vm1, %v1587_v3  ;;  %1356 = vmatmul.msk.f32.vlgmr.msrb.gmra.mxu1 %vm87_vm1, %v1599_v5 }
  0x86   :  { %v1865_v61 = vpop.permute.xlu2 %766  ;;  %v1869_v62 = vpop.permute.xlu1 %722 }
  0x87   :  { %2526 = vst [vmem:[#allocation10_spill] sm:$0xff] %v1865_v61  ;;  %1340 = vmatmul.msk.f32.gmra.mxu0 %vm87_vm1, %v1627_v17  ;;  %v1921_v12 = vpop.permute.xlu0 %714  ;;  %v2540_v61 = vmov 34  }
  0x89   :  { %1445 = vset.pattern.permute.xlu1 %v2523_v42 }
  0x8a   :  { %1446 = vset.pattern.permute.xlu2 %v1547_v33  ;;  %938 = vperm.xlu1 %1445, %v1687_v30  }
  0x8b   :  { %838 = vperm.xlu2 %1446, %v1643_v23   ;;  %1455 = vset.pattern.permute.xlu0 %v2524_v37 }
  0x8c   :  { %998 = vperm.xlu0 %1455, %v1599_v5   ;;  %1374 = vmatmul.msk.f32.gmra.mxu2 %vm87_vm1, %v1627_v17 }
  0x8d   :  { %1327 = vmatmul.msk.f32.gmra.mxu3 %vm87_vm1, %v1615_v14  ;;  %1357 = vmatmul.msk.f32.gmra.mxu1 %vm87_vm1, %v1627_v17 }
  0x8e   :  { %v1885_v63 = vpop.permute.xlu1 %738 }
  0x8f   :  { %1341 = vmatmul.msk.f32.gmra.mxu0 %vm87_vm1, %v1592_v4  ;;  %v1887_v0 = vpop.permute.xlu2 %810  ;;  %v735_v24 = vpop.permute.xlu0 %734 }
  0x92   :  { %934 = vperm.xlu1 %1445, %v1643_v23   ;;  %v1890_v1 = vpop.f32.mrf.mxu0 }
  0x93   :  { %834 = vperm.xlu2 %1446, %v1650_v25  }
  0x94   :  { %1375 = vmatmul.msk.f32.gmra.mxu2 %vm87_vm1, %v1592_v4 }
  0x95   :  { %1328 = vmatmul.msk.f32.gmra.mxu3 %vm87_vm1, %v1655_v26  ;;  %1358 = vmatmul.msk.f32.gmra.mxu1 %vm87_vm1, %v1592_v4 }
  0x96   :  { %v1903_v6 = vpop.permute.xlu1 %750 }
  0x97   :  { %1342 = vmatmul.msk.f32.gmra.mxu0 %vm87_vm1, %v1622_v16  ;;  %2527 = vst [vmem:[#allocation11_spill] sm:$0xff] %v1903_v6  ;;  %v1905_v7 = vpop.permute.xlu2 %822  ;;  %v1975_v41 = vpop.permute.xlu0 %746 }
  0x98   :  { %v1910_v9 = vpop.f32.mrf.mxu1 }
  0x9a   :  { %1447 = vset.pattern.permute.xlu1 %v2524_v37  ;;  %v1908_v8 = vpop.f32.mrf.mxu0 }
  0x9b   :  { %1448 = vset.pattern.permute.xlu2 %v2523_v42  ;;  %1030 = vperm.xlu1 %1447, %v1643_v23  }
  0x9c   :  { %v1914_v10 = vpop.f32.mrf.mxu2  ;;  %930 = vperm.xlu2 %1448, %v1650_v25   ;;  %v1919_v11 = vpop.f32.mrf.mxu3  ;;  %1376 = vmatmul.msk.f32.gmra.mxu2 %vm87_vm1, %v1622_v16 }
  0x9d   :  { %2528 = vst [vmem:[#allocation12_spill] sm:$0xff] %v1919_v11  ;;  %1329 = vmatmul.msk.f32.gmra.mxu3 %vm87_vm1, %v1650_v25  ;;  %1359 = vmatmul.msk.f32.gmra.mxu1 %vm87_vm1, %v1622_v16  ;;  %v613_v11 = vand.u32 2147483647, %v1890_v1 }
  0x9e   :  { %v1929_v13 = vpop.permute.xlu1 %762 }
  0x9f   :  { %1343 = vmatmul.msk.f32.gmra.mxu0 %vm87_vm1, %v1587_v3  ;;  %2529 = vst [vmem:[#allocation13_spill] sm:$0xff] %v1929_v13  ;;  %v1931_v15 = vpop.permute.xlu2 %866  ;;  %v2001_v50 = vpop.permute.xlu0 %758  ;;  %v773_v59 = vmul.f32 %v1892_v2, %v613_v11 }
  0xa0   :  { %v1935_v19 = vpop.f32.mrf.mxu1  ;;  %2536 = vst [vmem:[#allocation20_spill] sm:$0xff] %v2001_v50 }
  0xa2   :  { %v1933_v18 = vpop.f32.mrf.mxu0 }
  0xa3   :  { %1026 = vperm.xlu1 %1447, %v1650_v25  }
  0xa4   :  { %v1938_v20 = vpop.f32.mrf.mxu2  ;;  %926 = vperm.xlu2 %1448, %v1655_v26   ;;  %v1943_v22 = vpop.f32.mrf.mxu3  ;;  %1377 = vmatmul.msk.f32.gmra.mxu2 %vm87_vm1, %v1587_v3 }
  0xa5   :  { %2530 = vst [vmem:[#allocation14_spill] sm:$0xff] %v1943_v22  ;;  %1330 = vmatmul.msk.f32.gmra.mxu3 %vm87_vm1, %v1643_v23  ;;  %1360 = vmatmul.msk.f32.gmra.mxu1 %vm87_vm1, %v1587_v3 }
  0xa7   :  { %1344 = vmatmul.msk.f32.gmra.mxu0 %vm87_vm1, %v1615_v14 }
  0xa8   :  { %v1951_v33 = vpop.permute.xlu1 %806  ;;  %v1953_v34 = vpop.permute.xlu2 %1058 }
  0xa9   :  { %2531 = vst [vmem:[#allocation15_spill] sm:$0xff] %v1953_v34  ;;  %v1957_v36 = vpop.f32.mrf.mxu1  ;;  %v2539_v34 = vmov 35  }
  0xaa   :  { %v1955_v35 = vpop.f32.mrf.mxu0 }
  0xab   :  { %1022 = vperm.xlu1 %1447, %v1655_v26  }
  0xac   :  { %v1960_v38 = vpop.f32.mrf.mxu2  ;;  %922 = vperm.xlu2 %1448, %v1615_v14   ;;  %v1965_v39 = vpop.f32.mrf.mxu3  ;;  %1378 = vmatmul.msk.f32.gmra.mxu2 %vm87_vm1, %v1615_v14 }
  0xad   :  { %2532 = vst [vmem:[#allocation16_spill] sm:$0xff] %v1965_v39  ;;  %1331 = vmatmul.msk.f32.gmra.mxu3 %vm87_vm1, %v1687_v30  ;;  %1361 = vmatmul.msk.f32.gmra.mxu1 %vm87_vm1, %v1615_v14 }
  0xaf   :  { %1345 = vmatmul.msk.f32.gmra.mxu0 %vm87_vm1, %v1655_v26 }
  0xb0   :  { %v1973_v40 = vpop.permute.xlu1 %818 }
  0xb1   :  { %v1982_v45 = vpop.f32.mrf.mxu1 }
  0xb2   :  { %v1977_v43 = vpop.permute.xlu2 %858 }
  0xb3   :  { %2533 = vst [vmem:[#allocation17_spill] sm:$0xff] %v1977_v43  ;;  %1450 = vset.pattern.permute.xlu1 %v2523_v42  ;;  %v1980_v44 = vpop.f32.mrf.mxu0  ;;  %v2028_v43 = vpop.permute.xlu0 %770 }
  0xb4   :  { %1451 = vset.pattern.permute.xlu2 %v2524_v37  ;;  %918 = vperm.xlu1 %1450, %v1587_v3   ;;  %v1986_v46 = vpop.f32.mrf.mxu2  ;;  %v1988_v47 = vpop.f32.mrf.mxu3  ;;  %2541 = vst [vmem:[#allocation23_spill] sm:$0xff] %v2028_v43 }
  0xb5   :  { %2534 = vst [vmem:[#allocation18_spill] sm:$0xff] %v1988_v47  ;;  %1014 = vperm.xlu2 %1451, %v1587_v3   ;;  %1379 = vmatmul.msk.f32.gmra.mxu2 %vm87_vm1, %v1655_v26 }
  0xb6   :  { %1332 = vmatmul.msk.f32.gmra.mxu3 %vm87_vm1, %v1682_v29  ;;  %1362 = vmatmul.msk.f32.gmra.mxu1 %vm87_vm1, %v1655_v26 }
  0xb7   :  { %1346 = vmatmul.msk.f32.gmra.mxu0 %vm87_vm1, %v1650_v25 }
  0xb8   :  { %v827_v48 = vpop.permute.xlu1 %826 }
  0xb9   :  { %v2006_v3 = vpop.f32.mrf.mxu1 }
  0xba   :  { %v1999_v49 = vpop.permute.xlu2 %854 }
  0xbb   :  { %2535 = vst [vmem:[#allocation19_spill] sm:$0xff] %v1999_v49 }
  0xbc   :  { %v2003_v52 = vpop.f32.mrf.mxu0  ;;  %914 = vperm.xlu1 %1450, %v1622_v16   ;;  %v2008_v14 = vpop.f32.mrf.mxu2 }
  0xbd   :  { %1010 = vperm.xlu2 %1451, %v1622_v16   ;;  %v282_v53 = vpop.f32.mrf.mxu3  ;;  %1380 = vmatmul.msk.f32.gmra.mxu2 %vm87_vm1, %v1650_v25 }
  0xbe   :  { %v670_v54 = vand.u32 2147483647, %v282_v53  ;;  %1333 = vmatmul.msk.f32.gmra.mxu3 %vm87_vm1, %v1675_v28  ;;  %1363 = vmatmul.msk.f32.gmra.mxu1 %vm87_vm1, %v1650_v25 }
  0xbf   :  { %1347 = vmatmul.msk.f32.gmra.mxu0 %vm87_vm1, %v1643_v23 }
  0xc0   :  { %v863_v55 = vpop.permute.xlu1 %862 }
  0xc1   :  { %v2019_v57 = vmul.f32 %v863_v55, %v670_v54  ;;  %v255_v26 = vpop.f32.mrf.mxu1 }
  0xc2   :  { %v634_v53 = vand.u32 2147483647, %v255_v26  ;;  %v2067_v26 = vpop.permute.xlu0 %1054 }
  0xc3   :  { %2537 = vst [vmem:[#allocation21_spill] sm:$0xff] %v2019_v57  ;;  %v2021_v37 = vpop.permute.xlu2 %950 }
  0xc4   :  { %v193_v42 = vpop.f32.mrf.mxu0  ;;  %2538 = vst [vmem:[#allocation22_spill] sm:$0xff] %v2021_v37  ;;  %1453 = vset.pattern.permute.xlu1 %v2539_v34  ;;  %v2024_v39 = vpop.f32.mrf.mxu2 }
  0xc5   :  { %v637_v16 = vand.u32 2147483647, %v193_v42  ;;  %1454 = vset.pattern.permute.xlu2 %v2540_v61  ;;  %1006 = vperm.xlu1 %1453, %v1592_v4   ;;  %v285_v22 = vpop.f32.mrf.mxu3  ;;  %v2039_v61 = vmul.f32 %v827_v48, %v634_v53  ;;  %2546 = vst [vmem:[#allocation28_spill] sm:$0xff] %v2067_v26 }
  0xc6   :  { %906 = vperm.xlu2 %1454, %v1627_v17   ;;  %v674_v54 = vand.u32 2147483647, %v285_v22  ;;  %1381 = vmatmul.msk.f32.gmra.mxu2 %vm87_vm1, %v1643_v23 }
  0xc7   :  { %1348 = vmatmul.msk.f32.gmra.mxu0 %vm87_vm1, %v1687_v30  ;;  %v2033_v42 = vmul.f32 %v735_v24, %v637_v16  ;;  %1334 = vmatmul.msk.f32.gmra.mxu3 %vm87_vm1, %v1710_v32 }
  0xc8   :  { %v2044_v4 = vmul.f32 %v1931_v15, %v674_v54  ;;  %1364 = vmatmul.msk.f32.gmra.mxu1 %vm87_vm1, %v1643_v23 }
  0xc9   :  { %v2046_v34 = vpop.permute.xlu1 %958  ;;  %v2050_v16 = vpop.f32.mrf.mxu1 }
  0xca   :  { %2542 = vst [vmem:[#allocation24_spill] sm:$0xff] %v2044_v4 }
  0xcb   :  { %2543 = vst [vmem:[#allocation25_spill] sm:$0xff] %v2046_v34  ;;  %v2048_v22 = vpop.permute.xlu2 %946 }
  0xcc   :  { %v196_v55 = vpop.f32.mrf.mxu0  ;;  %2544 = vst [vmem:[#allocation26_spill] sm:$0xff] %v2048_v22  ;;  %v2052_v25 = vpop.f32.mrf.mxu2  ;;  %v614_v22 = vand.u32 2147483647, %v1910_v9 }
  0xcd   :  { %v641_v24 = vand.u32 2147483647, %v196_v55  ;;  %1002 = vperm.xlu1 %1453, %v1627_v17   ;;  %v2055_v48 = vpop.f32.mrf.mxu3  ;;  %v2091_v55 = vpop.permute.xlu0 %962 }
  0xce   :  { %2545 = vst [vmem:[#allocation27_spill] sm:$0xff] %v2055_v48  ;;  %902 = vperm.xlu2 %1454, %v1599_v5   ;;  %1382 = vmatmul.msk.f32.gmra.mxu2 %vm87_vm1, %v1687_v30 }
  0xcf   :  { %1349 = vmatmul.msk.f32.gmra.mxu0 %vm87_vm1, %v1682_v29  ;;  %v2061_v15 = vmul.f32 %v1885_v63, %v641_v24  ;;  %1335 = vmatmul.msk.f32.gmra.mxu3 %vm87_vm1, %v1638_v21  ;;  %2550 = vst [vmem:[#allocation32_spill] sm:$0xff] %v2091_v55 }
  0xd0   :  { %1365 = vmatmul.msk.f32.gmra.mxu1 %vm87_vm1, %v1687_v30 }
  0xd1   :  { %v2071_v17 = vpop.permute.xlu1 %954  ;;  %v2083_v23 = vpop.f32.mrf.mxu1 }
  0xd2   :  { %2547 = vst [vmem:[#allocation29_spill] sm:$0xff] %v2071_v17 }
  0xd4   :  { %v2073_v5 = vpop.f32.mrf.mxu0  ;;  %v2075_v53 = vpop.permute.xlu2 %1042 }
  0xd5   :  { %2548 = vst [vmem:[#allocation30_spill] sm:$0xff] %v2075_v53  ;;  %v2077_v54 = vpop.f32.mrf.mxu2  ;;  %v2079_v63 = vpop.f32.mrf.mxu3 }
  0xd6   :  { %2549 = vst [vmem:[#allocation31_spill] sm:$0xff] %v2079_v63  ;;  %1383 = vmatmul.msk.f32.gmra.mxu2 %vm87_vm1, %v1682_v29  ;;  %v2118_v55 = vpop.permute.xlu0 %942 }
  0xd7   :  { %1350 = vmatmul.msk.f32.gmra.mxu0 %vm87_vm1, %v1675_v28  ;;  %1336 = vmatmul.msk.f32.gmra.mxu3 %vm87_vm1, %v1670_v27  ;;  %2557 = vst [vmem:[#allocation39_spill] sm:$0xff] %v2118_v55 }
  0xd8   :  { %1366 = vmatmul.msk.f32.gmra.mxu1 %vm87_vm1, %v1682_v29 }
  0xd9   :  { %v2103_v30 = vpop.f32.mrf.mxu1 }
  0xda   :  { %v2093_v24 = vpop.permute.xlu1 %1050 }
  0xdb   :  { %2551 = vst [vmem:[#allocation33_spill] sm:$0xff] %v2093_v24 }
  0xdc   :  { %v202_v53 = vpop.f32.mrf.mxu0  ;;  %v2095_v43 = vpop.permute.xlu2 %1038 }
  0xdd   :  { %v649_v4 = vand.u32 2147483647, %v202_v53  ;;  %2552 = vst [vmem:[#allocation34_spill] sm:$0xff] %v2095_v43  ;;  %v2097_v26 = vpop.f32.mrf.mxu2  ;;  %v2099_v57 = vpop.f32.mrf.mxu3 }
  0xde   :  { %2553 = vst [vmem:[#allocation35_spill] sm:$0xff] %v2099_v57  ;;  %1384 = vmatmul.msk.f32.gmra.mxu2 %vm87_vm1, %v1675_v28  ;;  %v2146_v48 = vpop.permute.xlu0 %814 }
  0xdf   :  { %1351 = vmatmul.msk.f32.gmra.mxu0 %vm87_vm1, %v1710_v32  ;;  %v2106_v34 = vmul.f32 %v1975_v41, %v649_v4  ;;  %1337 = vmatmul.msk.f32.gmra.mxu3 %vm87_vm1, %v1701_v31 }
  0xe0   :  { %1367 = vmatmul.msk.f32.gmra.mxu1 %vm87_vm1, %v1675_v28 }
  0xe1   :  { %2554 = vst [vmem:[#allocation36_spill] sm:$0xff] %v2106_v34  ;;  %v2132_v29 = vpop.f32.mrf.mxu1 }
  0xe2   :  { %v2114_v53 = vpop.permute.xlu1 %1046  ;;  %2558 = vst [vmem:[#allocation40_spill] sm:$0xff] %v2132_v29 }
  0xe3   :  { %2555 = vst [vmem:[#allocation37_spill] sm:$0xff] %v2114_v53 }
  0xe4   :  { %v2116_v43 = vpop.f32.mrf.mxu0 }
  0xe5   :  { %2556 = vst [vmem:[#allocation38_spill] sm:$0xff] %v2116_v43  ;;  %v2120_v24 = vpop.f32.mrf.mxu2  ;;  %v2122_v57 = vpop.permute.xlu2 %838 }
  0xe6   :  { %v2124_v41 = vpop.f32.mrf.mxu3  ;;  %1385 = vmatmul.msk.f32.gmra.mxu2 %vm87_vm1, %v1710_v32  ;;  %v2174_v1 = vpop.permute.xlu0 %850 }
  0xe7   :  { %1352 = vmatmul.msk.f32.gmra.mxu0 %vm87_vm1, %v1638_v21  ;;  %2567 = vst [vmem:[#allocation49_spill] sm:$0xff] %v2174_v1 }
  0xe8   :  { %1368 = vmatmul.msk.f32.gmra.mxu1 %vm87_vm1, %v1710_v32 }
  0xe9   :  { %v2152_v28 = vpop.f32.mrf.mxu1 }
  0xea   :  { %2562 = vst [vmem:[#allocation44_spill] sm:$0xff] %v2152_v28 }
  0xeb   :  { %v2134_v4 = vpop.permute.xlu1 %846 }
  0xec   :  { %2559 = vst [vmem:[#allocation41_spill] sm:$0xff] %v2134_v4  ;;  %v2136_v53 = vpop.f32.mrf.mxu0  ;;  %v869_v4 = vmul.f32 %v1951_v33, %v614_v22 }
  0xed   :  { %2560 = vst [vmem:[#allocation42_spill] sm:$0xff] %v2136_v53  ;;  %v2138_v63 = vpop.permute.xlu2 %834  ;;  %v2140_v17 = vpop.f32.mrf.mxu2 }
  0xee   :  { %2561 = vst [vmem:[#allocation43_spill] sm:$0xff] %v2140_v17  ;;  %v2144_v13 = vpop.f32.mrf.mxu3  ;;  %1386 = vmatmul.msk.f32.gmra.mxu2 %vm87_vm1, %v1638_v21  ;;  %v2197_v33 = vpop.permute.xlu0 %830 }
  0xef   :  { %1353 = vmatmul.msk.f32.gmra.mxu0 %vm87_vm1, %v1670_v27 }
  0xf0   :  { %1369 = vmatmul.msk.f32.gmra.mxu1 %vm87_vm1, %v1638_v21  ;;  %v617_v21 = vand.u32 2147483647, %v1908_v8 }
  0xf2   :  { %v774_v8 = vmul.f32 %v1921_v12, %v617_v21 }
  0xf3   :  { %v2154_v47 = vpop.permute.xlu1 %842 }
  0xf4   :  { %2563 = vst [vmem:[#allocation45_spill] sm:$0xff] %v2154_v47  ;;  %v2156_v37 = vpop.f32.mrf.mxu0 }
  0xf5   :  { %2564 = vst [vmem:[#allocation46_spill] sm:$0xff] %v2156_v37  ;;  %v2163_v50 = vpop.f32.mrf.mxu2  ;;  %v2172_v37 = vpop.f32.mrf.mxu1 }
  0xf6   :  { %v2159_v49 = vpop.permute.xlu2 %930  ;;  %2565 = vst [vmem:[#allocation47_spill] sm:$0xff] %v2163_v50  ;;  %1387 = vmatmul.msk.f32.gmra.mxu2 %vm87_vm1, %v1670_v27  ;;  %v2169_v32 = vpop.f32.mrf.mxu3 }
  0xf7   :  { %1354 = vmatmul.msk.f32.gmra.mxu0 %vm87_vm1, %v1701_v31  ;;  %2566 = vst [vmem:[#allocation48_spill] sm:$0xff] %v2172_v37 }
  0xf8   :  { %1370 = vmatmul.msk.f32.gmra.mxu1 %vm87_vm1, %v1670_v27 }
  0xfc   :  { %v435_v55 = vpop.f32.mrf.mxu0  ;;  %v2178_v53 = vpop.permute.xlu1 %938 }
  0xfd   :  { %v789_v50 = vadd.f32 %v773_v59, %v435_v55  ;;  %2568 = vst [vmem:[#allocation50_spill] sm:$0xff] %v2178_v53  ;;  %v618_v59 = vand.u32 2147483647, %v1935_v19  ;;  %v2194_v11 = vpop.f32.mrf.mxu1 }
  0xfe   :  { %v2183_v17 = vpop.permute.xlu2 %926  ;;  %1388 = vmatmul.msk.f32.gmra.mxu2 %vm87_vm1, %v1701_v31  ;;  %v2189_v9 = vpop.f32.mrf.mxu2  ;;  %2570 = vst [vmem:[#allocation52_spill] sm:$0xff] %v2194_v11 }
  0xff   :  { %v2181_v6 = vadd.f32 %v869_v4, %v789_v50  ;;  %2569 = vst [vmem:[#allocation51_spill] sm:$0xff] %v2189_v9  ;;  %v2191_v2 = vpop.f32.mrf.mxu3  ;;  %v870_v22 = vmul.f32 %v1887_v0, %v618_v59  ;;  %v621_v4 = vand.u32 2147483647, %v1933_v18  ;;  %v2214_v0 = vpop.permute.xlu0 %1034 }
 0x100   :  { %1371 = vmatmul.msk.f32.gmra.mxu1 %vm87_vm1, %v1701_v31  ;;  %2572 = vst [vmem:[#allocation54_spill] sm:$0xff] %v2214_v0  ;;  %v626_v31 = vand.u32 2147483647, %v1982_v45  ;;  %v630_v45 = vand.u32 2147483647, %v2006_v3 }
 0x101   :  { %v775_v21 = vmul.f32 %v1853_v60, %v621_v4 }
 0x102   :  { %v872_v34 = vmul.f32 %v1973_v40, %v626_v31  ;;  %v873_v31 = vmul.f32 %v1905_v7, %v630_v45 }
 0x104   :  { %v438_v50 = vpop.f32.mrf.mxu0  ;;  %v2200_v27 = vpop.permute.xlu1 %934 }
 0x105   :  { %v790_v55 = vadd.f32 %v774_v8, %v438_v50  ;;  %v2211_v12 = vpop.f32.mrf.mxu1  ;;  %v625_v50 = vand.u32 2147483647, %v1955_v35  ;;  %v629_v35 = vand.u32 2147483647, %v1980_v44  ;;  %v633_v44 = vand.u32 2147483647, %v2003_v52 }
 0x106   :  { %v923_v9 = vpop.permute.xlu2 %922  ;;  %v2207_v19 = vpop.f32.mrf.mxu2  ;;  %v623_v52 = vand.u32 2147483647, %v1960_v38  ;;  %v646_v38 = vand.u32 2147483647, %v2103_v30  ;;  %v647_v30 = vand.u32 2147483647, %v2097_v26 }
 0x107   :  { %v2203_v1 = vadd.f32 %v870_v22, %v790_v55  ;;  %v2209_v11 = vpop.f32.mrf.mxu3  ;;  %v776_v60 = vmul.f32 %v1869_v62, %v625_v50  ;;  %v777_v40 = vmul.f32 %v1805_v51, %v629_v35  ;;  %v615_v51 = vand.u32 2147483647, %v1914_v10 }
 0x108   :  { %v778_v45 = vmul.f32 %v1820_v56, %v633_v44  ;;  %v639_v56 = vand.u32 2147483647, %v2052_v25  ;;  %v642_v25 = vand.u32 2147483647, %v2083_v23 }
 0x109   :  { %2571 = vst [vmem:[#allocation53_spill] sm:$0xff] %v2203_v1 }
 0x10c   :  { %v441_v59 = vpop.f32.mrf.mxu0 }
 0x10d   :  { %v2216_v8 = vadd.f32 %v775_v21, %v441_v59  ;;  %v2218_v18 = vpop.permute.xlu1 %1030  ;;  %v2226_v28 = vpop.f32.mrf.mxu1 }
 0x10e   :  { %2573 = vst [vmem:[#allocation55_spill] sm:$0xff] %v2218_v18  ;;  %v1019_v59 = vpop.permute.xlu0 %1018  ;;  %v635_v18 = vand.u32 2147483647, %v2024_v39  ;;  %v616_v39 = vand.u32 2147483647, %v2124_v41 }
 0x10f   :  { %v2221_v22 = vpop.permute.xlu2 %1014  ;;  %v2224_v55 = vpop.f32.mrf.mxu2  ;;  %2575 = vst [vmem:[#allocation57_spill] sm:$0xff] %v2226_v28 }
 0x110   :  { %2574 = vst [vmem:[#allocation56_spill] sm:$0xff] %v2224_v55  ;;  %v385_v37 = vpop.f32.mrf.mxu3  ;;  %v970_v44 = vmul.f32 %v923_v9, %v635_v18 }
 0x111   :  { %v636_v7 = vand.u32 2147483647, %v385_v37  ;;  %v638_v37 = vand.u32 2147483647, %v2050_v16 }
 0x113   :  { %v875_v16 = vmul.f32 %v2197_v33, %v638_v37  ;;  %v876_v33 = vmul.f32 %v2138_v63, %v642_v25  ;;  %v693_v37 = vmax.f32 %v2207_v19, 0.0 }
 0x114   :  { %v444_v4 = vpop.f32.mrf.mxu0 }
 0x115   :  { %v792_v21 = vadd.f32 %v776_v60, %v444_v4  ;;  %v2230_v0 = vpop.permute.xlu1 %1026  ;;  %v2242_v62 = vpop.f32.mrf.mxu1 }
 0x116   :  { %2577 = vst [vmem:[#allocation59_spill] sm:$0xff] %v2242_v62  ;;  %v631_v62 = vand.u32 2147483647, %v2008_v14  ;;  %v643_v14 = vand.u32 2147483647, %v2077_v54 }
 0x117   :  { %v2233_v53 = vadd.f32 %v872_v34, %v792_v21  ;;  %v2235_v47 = vpop.permute.xlu2 %1010  ;;  %v2238_v55 = vpop.f32.mrf.mxu2 }
 0x118   :  { %2576 = vst [vmem:[#allocation58_spill] sm:$0xff] %v2238_v55  ;;  %v2240_v28 = vpop.f32.mrf.mxu3  ;;  %v911_v21 = vpop.permute.xlu0 %910 }
 0x119   :  { %v640_v23 = vand.u32 2147483647, %v2240_v28  ;;  %v628_v28 = vand.u32 2147483647, %v2191_v2 }
 0x11c   :  { %v447_v50 = vpop.f32.mrf.mxu0 }
 0x11d   :  { %v793_v60 = vadd.f32 %v777_v40, %v447_v50  ;;  %v2246_v4 = vpop.permute.xlu1 %1022  ;;  %v2253_v55 = vpop.f32.mrf.mxu1  ;;  %v622_v40 = vand.u32 2147483647, %v1957_v36  ;;  %v645_v50 = vand.u32 2147483647, %v2073_v5  ;;  %v632_v36 = vand.u32 2147483647, %v2209_v11 }
 0x11e   :  { %v1066_v5 = vmul.f32 %v1019_v59, %v636_v7 }
 0x11f   :  { %v889_v34 = vadd.f32 %v873_v31, %v793_v60  ;;  %v2251_v3 = vpop.f32.mrf.mxu2  ;;  %v627_v60 = vand.u32 2147483647, %v1986_v46  ;;  %v871_v10 = vmul.f32 %v2146_v48, %v622_v40  ;;  %v2275_v48 = vmul.f32 %v1834_v58, %v645_v50 }
 0x120   :  { %v2249_v43 = vpop.permute.xlu2 %906  ;;  %v2255_v29 = vpop.f32.mrf.mxu3  ;;  %v1065_v54 = vmul.f32 %v2221_v22, %v632_v36  ;;  %v2287_v58 = vmul.f32 %v2122_v57, %v646_v38  ;;  %v967_v40 = vmul.f32 %v911_v21, %v623_v52  ;;  %v971_v57 = vmul.f32 %v2183_v17, %v639_v56  ;;  %v2311_v21 = vld [vmem:[%s2520_s2] ss:$0 sm:$0xff]  ;;  %s1552_s2 = smov [#allocation6]  }
 0x121   :  { %v1067_v17 = vmul.f32 %v2246_v4, %v640_v23  ;;  %v644_v2 = vand.u32 2147483647, %v2255_v29  ;;  %v677_v4 = vand.u32 2147483647, %v2211_v12  ;;  %v2325_v29 = vmul.f32 %v2311_v21, %v693_v37  ;;  %v2581_v12 = vld [vmem:[#allocation40_spill] sm:$0xff]  ;;  %s1258_s27 = sshll.u32 %s1552_s2, 4  ;;  %s1259_s27 = int_to_ptr.vmem [resolvable:$true] %s1258_s27 }
 0x122   :  { %v680_v37 = vand.u32 2147483647, %v2253_v55 }
 0x123   :  { %v1068_v25 = vmul.f32 %v2230_v0, %v644_v2  ;;  %v2579_v2 = vld [vmem:[#allocation53_spill] sm:$0xff] }
 0x124   :  { %v450_v31 = vpop.f32.mrf.mxu0 }
 0x125   :  { %v794_v1 = vadd.f32 %v778_v45, %v450_v31  ;;  %v999_v45 = vpop.permute.xlu0 %998  ;;  %v2284_v59 = vpop.f32.mrf.mxu1 }
 0x126   :  { %v919_v46 = vpop.permute.xlu1 %918 }
 0x127   :  { %v890_v35 = vadd.f32 %v2039_v61, %v794_v1  ;;  %v969_v31 = vmul.f32 %v919_v46, %v631_v62  ;;  %v2280_v18 = vpop.f32.mrf.mxu2  ;;  %v651_v61 = vand.u32 2147483647, %v2120_v24  ;;  %v620_v62 = vand.u32 2147483647, %v2144_v13  ;;  %v2582_v13 = vld [vmem:[#allocation38_spill] sm:$0xff] }
 0x128   :  { %v903_v11 = vpop.permute.xlu2 %902 }
 0x129   :  { %v986_v9 = vadd.f32 %v970_v44, %v890_v35  ;;  %v985_v41 = vadd.f32 %v969_v31, %v889_v34  ;;  %v965_v1 = vmul.f32 %v903_v11, %v615_v51  ;;  %v1061_v35 = vmul.f32 %v999_v45, %v616_v39  ;;  %v2297_v51 = vpop.f32.mrf.mxu3 }
 0x12a   :  { %v972_v44 = vmul.f32 %v2159_v49, %v643_v14  ;;  %v1064_v39 = vmul.f32 %v2235_v47, %v628_v28 }
 0x12b   :  { %v2291_v26 = vadd.f32 %v1066_v5, %v986_v9  ;;  %v2294_v7 = vadd.f32 %v1065_v54, %v985_v41  ;;  %v981_v22 = vadd.f32 %v965_v1, %v2181_v6  ;;  %v887_v6 = vadd.f32 %v871_v10, %v2216_v8 }
 0x12c   :  { %v453_v34 = vpop.f32.mrf.mxu0  ;;  %v624_v8 = vand.u32 2147483647, %v2169_v32  ;;  %v2319_v10 = vmul.f32 %v2200_v27, %v647_v30  ;;  %v2578_v27 = vand.u32 2147483647, %v1938_v20  ;;  %v697_v9 = vmax.f32 %v2280_v18, 0.0 }
 0x12d   :  { %v795_v50 = vadd.f32 %v2033_v42, %v453_v34  ;;  %v1119_v63 = vmul.f32 1.442695, %v2291_v26  ;;  %v1117_v36 = vmul.f32 1.442695, %v2294_v7  ;;  %v2305_v38 = vadd.f32 %v1061_v35, %v981_v22  ;;  %v515_v49 = vpop.f32.mrf.mxu1 }
 0x12e   :  { %v915_v52 = vpop.permute.xlu1 %914  ;;  %v983_v32 = vadd.f32 %v967_v40, %v887_v6  ;;  %v966_v31 = vmul.f32 %v2249_v43, %v2578_v27  ;;  %v682_v54 = vand.u32 2147483647, %v515_v49  ;;  %v681_v20 = vand.u32 2147483647, %v2284_v59 }
 0x12f   :  { %v891_v42 = vadd.f32 %v875_v16, %v795_v50  ;;  %1459 = vpow2.f32 %v1119_v63  ;;  %v1109_v19 = vmul.f32 1.442695, %v2305_v38  ;;  %v968_v56 = vmul.f32 %v915_v52, %v627_v60  ;;  %v580_v46 = vpop.f32.mrf.mxu2 }
 0x130   :  { %1461 = vpow2.f32 %v1117_v36  ;;  %v698_v14 = vmax.f32 %v580_v46, 0.0  ;;  %v696_v16 = vmax.f32 %v2251_v3, 0.0  ;;  %vm1098_vm2 = vcmp.gt.f32.partialorder %v2291_v26, 0.0  ;;  %v2584_v3 = vld [vmem:[#allocation50_spill] sm:$0xff] }
 0x131   :  { %v987_v5 = vadd.f32 %v971_v57, %v891_v42  ;;  %1463 = vpow2.f32 %v1109_v19  ;;  %v984_v45 = vadd.f32 %v968_v56, %v2233_v53  ;;  %v2342_v0 = vpop.f32.mrf.mxu3  ;;  %vm1097_vm3 = vcmp.gt.f32.partialorder %v2294_v7, 0.0 }
 0x132   :  { %v1198_v34 = vmul.f32 %v2311_v21, %v698_v14  ;;  %v1197_v36 = vmul.f32 %v2311_v21, %v697_v9  ;;  %vm1093_vm4 = vcmp.gt.f32.partialorder %v2305_v38, 0.0  ;;  %v982_v19 = vadd.f32 %v966_v31, %v2579_v2  ;;  %v2588_v2 = vld [vmem:[#allocation44_spill] sm:$0xff] }
 0x133   :  { %v2327_v60 = vadd.f32 %v1067_v17, %v987_v5  ;;  %v2334_v47 = vadd.f32 %v1064_v39, %v984_v45 }
 0x134   :  { %v456_v30 = vpop.f32.mrf.mxu0 }
 0x135   :  { %v1460_v53 = vpop.eup %1459  ;;  %v796_v11 = vadd.f32 %v2061_v15, %v456_v30  ;;  %v1121_v41 = vmul.f32 1.442695, %v2327_v60  ;;  %v1115_v43 = vmul.f32 1.442695, %v2334_v47  ;;  %v648_v15 = vand.u32 2147483647, %v2297_v51  ;;  %v518_v51 = vpop.f32.mrf.mxu1 }
 0x136   :  { %v1462_v1 = vpop.eup %1461  ;;  %v1394_v23 = vadd.f32 -1.0, %v1460_v53  ;;  %v683_v45 = vand.u32 2147483647, %v518_v51  ;;  %vm1099_vm5 = vcmp.gt.f32.partialorder %v2327_v60, 0.0  ;;  %vm1096_vm6 = vcmp.gt.f32.partialorder %v2334_v47, 0.0 }
 0x137   :  { %v1393_v35 = vadd.f32 -1.0, %v1462_v1  ;;  %v892_v22 = vadd.f32 %v876_v33, %v796_v11  ;;  %1465 = vpow2.f32 %v1121_v41  ;;  %v1464_v18 = vpop.eup %1463  ;;  %v1007_v40 = vpop.permute.xlu1 %1006 }
 0x138   :  { %1467 = vpow2.f32 %v1115_v43  ;;  %v1162_v59 = vsel %vm1098_vm2, %v2291_v26, %v1394_v23  ;;  %v1389_v57 = vadd.f32 -1.0, %v1464_v18  ;;  %v1063_v6 = vmul.f32 %v1007_v40, %v624_v8  ;;  %v583_v17 = vpop.f32.mrf.mxu2  ;;  %v2580_v8 = vld [vmem:[#allocation55_spill] sm:$0xff] }
 0x139   :  { %v1161_v50 = vsel %vm1097_vm3, %v2294_v7, %v1393_v35  ;;  %v988_v63 = vadd.f32 %v972_v44, %v892_v22  ;;  %v1178_v28 = vmul.f32 %v1162_v59, %v682_v54  ;;  %v699_v52 = vmax.f32 %v583_v17, 0.0  ;;  %v2374_v9 = vpop.f32.mrf.mxu3 }
 0x13a   :  { %v1177_v33 = vmul.f32 %v1161_v50, %v681_v20  ;;  %v2357_v7 = vadd.f32 %v1063_v6, %v983_v32  ;;  %v1157_v55 = vsel %vm1093_vm4, %v2305_v38, %v1389_v57  ;;  %v1069_v46 = vmul.f32 %v2580_v8, %v648_v15  ;;  %v2586_v57 = vld [vmem:[#allocation54_spill] sm:$0xff] }
 0x13b   :  { %v2352_v42 = vadd.f32 %v1068_v25, %v988_v63  ;;  %v2354_v26 = vadd.f32 %v1198_v34, %v1178_v28  ;;  %v1199_v31 = vmul.f32 %v2311_v21, %v699_v52  ;;  %v1173_v38 = vmul.f32 %v1157_v55, %v677_v4  ;;  %v2587_v28 = vld [vmem:[#allocation36_spill] sm:$0xff] }
 0x13c   :  { %v459_v56 = vpop.f32.mrf.mxu0  ;;  %v2359_v44 = vadd.f32 %v1197_v36, %v1177_v33  ;;  %v1113_v27 = vmul.f32 1.442695, %v2357_v7  ;;  %v650_v4 = vand.u32 2147483647, %v2581_v12  ;;  %v1196_v20 = vmul.f32 %v2311_v21, %v696_v16 }
 0x13d   :  { %v1466_v5 = vpop.eup %1465  ;;  %v797_v39 = vadd.f32 %v2275_v48, %v459_v56  ;;  %v1123_v49 = vmul.f32 1.442695, %v2352_v42  ;;  %v652_v48 = vand.u32 2147483647, %v2342_v0  ;;  %v974_v18 = vmul.f32 %v2584_v3, %v651_v61  ;;  %v521_v33 = vpop.f32.mrf.mxu1  ;;  %v2589_v56 = vld [vmem:[#allocation59_spill] sm:$0xff] }
 0x13e   :  { %v1468_v14 = vpop.eup %1467  ;;  %v1395_v32 = vadd.f32 -1.0, %v1466_v5  ;;  %v684_v6 = vand.u32 2147483647, %v521_v33  ;;  %vm1100_vm7 = vcmp.gt.f32.partialorder %v2352_v42, 0.0  ;;  %v679_v55 = vand.u32 2147483647, %v2589_v56 }
 0x13f   :  { %v1392_v25 = vadd.f32 -1.0, %v1468_v14  ;;  %v893_v30 = vadd.f32 %v2287_v58, %v797_v39  ;;  %1469 = vpow2.f32 %v1123_v49  ;;  %v1003_v11 = vpop.permute.xlu1 %1002  ;;  %v1070_v50 = vmul.f32 %v2586_v57, %v652_v48 }
 0x140   :  { %1471 = vpow2.f32 %v1113_v27  ;;  %v1163_v53 = vsel %vm1099_vm5, %v2327_v60, %v1395_v32  ;;  %v1062_v58 = vmul.f32 %v1003_v11, %v620_v62  ;;  %v586_v43 = vpop.f32.mrf.mxu2  ;;  %v2385_v60 = vadd.f32 %v2325_v29, %v1173_v38  ;;  %v2585_v29 = vld [vmem:[#allocation58_spill] sm:$0xff] }
 0x141   :  { %v989_v54 = vadd.f32 %v2319_v10, %v893_v30  ;;  %v1179_v41 = vmul.f32 %v1163_v53, %v683_v45  ;;  %v1160_v1 = vsel %vm1096_vm6, %v2334_v47, %v1392_v25  ;;  %v700_v35 = vmax.f32 %v586_v43, 0.0  ;;  %v2583_v47 = vld [vmem:[#allocation45_spill] sm:$0xff]  ;;  %v2590_v45 = vld [vmem:[#allocation43_spill] sm:$0xff]  ;;  %v2411_v27 = vpop.f32.mrf.mxu3  ;;  %v2592_v53 = vld [vmem:[#allocation42_spill] sm:$0xff] }
 0x142   :  { %v1176_v23 = vmul.f32 %v1160_v1, %v680_v37  ;;  %v1078_v10 = vadd.f32 %v1062_v58, %v982_v19  ;;  %v653_v62 = vand.u32 2147483647, %v2582_v13  ;;  %v878_v34 = vmul.f32 %v2583_v47, %v650_v4  ;;  %v2591_v25 = vld [vmem:[#allocation11_spill] sm:$0xff]  ;;  %v2594_v1 = vld [vmem:[#allocation56_spill] sm:$0xff]  ;;  %v2596_v13 = vld [vmem:[#allocation57_spill] sm:$0xff] }
 0x143   :  { %v2387_v0 = vadd.f32 %v1069_v46, %v989_v54  ;;  %v2389_v22 = vadd.f32 %v1199_v31, %v1179_v41  ;;  %v695_v40 = vmax.f32 %v2585_v29, 0.0  ;;  %v1200_v24 = vmul.f32 %v2311_v21, %v700_v35 }
 0x144   :  { %v462_v16 = vpop.f32.mrf.mxu0  ;;  %v2396_v15 = vadd.f32 %v1196_v20, %v1176_v23  ;;  %v1111_v63 = vmul.f32 1.442695, %v1078_v10  ;;  %v654_v19 = vand.u32 2147483647, %v2588_v2  ;;  %vm1095_vm8 = vcmp.gt.f32.partialorder %v2357_v7, 0.0  ;;  %v2595_v23 = vld [vmem:[#allocation39_spill] sm:$0xff] }
 0x145   :  { %v1470_v59 = vpop.eup %1469  ;;  %v798_v37 = vadd.f32 %v2587_v28, %v462_v16  ;;  %v1125_v52 = vmul.f32 1.442695, %v2387_v0  ;;  %v655_v49 = vand.u32 2147483647, %v2590_v45  ;;  %v1195_v14 = vmul.f32 %v2311_v21, %v695_v40  ;;  %v524_v20 = vpop.f32.mrf.mxu1 }
 0x146   :  { %v1472_v36 = vpop.eup %1471  ;;  %v1396_v17 = vadd.f32 -1.0, %v1470_v59  ;;  %1473 = vpow2.f32 %v1111_v63  ;;  %v783_v30 = vmul.f32 %v2591_v25, %v653_v62  ;;  %v694_v12 = vmax.f32 %v2594_v1, 0.0  ;;  %v2597_v59 = vld [vmem:[#allocation48_spill] sm:$0xff] }
 0x147   :  { %v1391_v61 = vadd.f32 -1.0, %v1472_v36  ;;  %v894_v51 = vadd.f32 %v878_v34, %v798_v37  ;;  %1475 = vpow2.f32 %v1125_v52  ;;  %v975_v35 = vmul.f32 %v2595_v23, %v655_v49  ;;  %v2598_v36 = vld [vmem:[#allocation47_spill] sm:$0xff] }
 0x148   :  { %v1164_v5 = vsel %vm1100_vm7, %v2352_v42, %v1396_v17  ;;  %v657_v42 = vand.u32 2147483647, %v2592_v53  ;;  %v678_v62 = vand.u32 2147483647, %v2596_v13  ;;  %vm1094_vm9 = vcmp.gt.f32.partialorder %v1078_v10, 0.0 }
 0x149   :  { %v990_v8 = vadd.f32 %v974_v18, %v894_v51  ;;  %v1180_v46 = vmul.f32 %v1164_v5, %v684_v6  ;;  %v1159_v39 = vsel %vm1095_vm8, %v2357_v7, %v1391_v61  ;;  %v589_v38 = vpop.f32.mrf.mxu2  ;;  %v2593_v7 = vld [vmem:[#allocation41_spill] sm:$0xff]  ;;  %v685_v16 = vand.u32 2147483647, %v524_v20 }
 0x14a   :  { %v1175_v32 = vmul.f32 %v1159_v39, %v679_v55  ;;  %v879_v58 = vmul.f32 %v2593_v7, %v654_v19  ;;  %v701_v34 = vmax.f32 %v589_v38, 0.0  ;;  %v658_v29 = vand.u32 2147483647, %v2597_v59  ;;  %v2600_v55 = vld [vmem:[#allocation49_spill] sm:$0xff] }
 0x14b   :  { %v1086_v31 = vadd.f32 %v1070_v50, %v990_v8  ;;  %v2414_v48 = vadd.f32 %v1200_v24, %v1180_v46  ;;  %v1194_v50 = vmul.f32 %v2311_v21, %v694_v12  ;;  %vm1101_vm10 = vcmp.gt.f32.partialorder %v2387_v0, 0.0  ;;  %v2599_v24 = vld [vmem:[#allocation9_spill] sm:$0xff]  ;;  %v2605_v12 = vld [vmem:[#allocation20_spill] sm:$0xff] }
 0x14c   :  { %v465_v11 = vpop.f32.mrf.mxu0  ;;  %v2417_v54 = vadd.f32 %v1195_v14, %v1175_v32  ;;  %v1474_v41 = vpop.eup %1473  ;;  %v1201_v33 = vmul.f32 %v2311_v21, %v701_v34  ;;  %v659_v6 = vand.u32 2147483647, %v2598_v36  ;;  %v784_v61 = vmul.f32 %v2599_v24, %v657_v42  ;;  %v2602_v32 = vld [vmem:[#allocation26_spill] sm:$0xff]  ;;  %v2603_v42 = vld [vmem:[#allocation52_spill] sm:$0xff] }
 0x14d   :  { %v799_v4 = vadd.f32 %v783_v30, %v465_v11  ;;  %v1127_v43 = vmul.f32 1.442695, %v1086_v31  ;;  %v1390_v47 = vadd.f32 -1.0, %v1474_v41  ;;  %v1476_v3 = vpop.eup %1475  ;;  %v880_v5 = vmul.f32 %v2600_v55, %v658_v29  ;;  %v527_v46 = vpop.f32.mrf.mxu1  ;;  %v2607_v34 = vld [vmem:[#allocation12_spill] sm:$0xff]  ;;  %v2609_v29 = vld [vmem:[#allocation18_spill] sm:$0xff] }
 0x14e   :  { %v1397_v40 = vadd.f32 -1.0, %v1476_v3  ;;  %v686_v45 = vand.u32 2147483647, %v527_v46  ;;  %v976_v25 = vmul.f32 %v2602_v32, %v659_v6  ;;  %vm1102_vm11 = vcmp.gt.f32.partialorder %v1086_v31, 0.0 }
 0x14f   :  { %v895_v18 = vadd.f32 %v879_v58, %v799_v4  ;;  %1477 = vpow2.f32 %v1127_v43  ;;  %v1158_v57 = vsel %vm1094_vm9, %v1078_v10, %v1390_v47  ;;  %v2434_v10 = vpop.f32.mrf.mxu3  ;;  %v662_v11 = vand.u32 2147483647, %v2603_v42  ;;  %v2604_v58 = vld [vmem:[#allocation51_spill] sm:$0xff]  ;;  %v2617_v42 = vld [vmem:[#allocation16_spill] sm:$0xff] }
 0x150   :  { %v1174_v28 = vmul.f32 %v1158_v57, %v678_v62  ;;  %v1165_v37 = vsel %vm1101_vm10, %v2387_v0, %v1397_v40  ;;  %v2601_v0 = vld [vmem:[#allocation46_spill] sm:$0xff]  ;;  %v663_v1 = vand.u32 2147483647, %v2604_v58  ;;  %v665_v3 = vand.u32 2147483647, %v2607_v34  ;;  %v2621_v34 = vld [vmem:[#allocation35_spill] sm:$0xff] }
 0x151   :  { %v2425_v63 = vadd.f32 %v975_v35, %v895_v18  ;;  %v1181_v17 = vmul.f32 %v1165_v37, %v685_v16  ;;  %v592_v51 = vpop.f32.mrf.mxu2  ;;  %v661_v39 = vand.u32 2147483647, %v2601_v0  ;;  %v2606_v35 = vld [vmem:[#allocation19_spill] sm:$0xff]  ;;  %v2608_v18 = vld [vmem:[#allocation22_spill] sm:$0xff]  ;;  %v666_v40 = vand.u32 2147483647, %v2609_v29 }
 0x152   :  { %v2432_v52 = vadd.f32 %v1194_v50, %v1174_v28  ;;  %v702_v19 = vmax.f32 %v592_v51, 0.0  ;;  %v881_v13 = vmul.f32 %v2606_v35, %v662_v11  ;;  %v977_v16 = vmul.f32 %v2608_v18, %v663_v1  ;;  %v2610_v50 = vld [vmem:[#allocation27_spill] sm:$0xff]  ;;  %v2611_v37 = vld [vmem:[#allocation13_spill] sm:$0xff] }
 0x153   :  { %v2438_v14 = vadd.f32 %v1201_v33, %v1181_v17  ;;  %v785_v4 = vmul.f32 %v2605_v12, %v661_v39  ;;  %v667_v28 = vand.u32 2147483647, %v2610_v50  ;;  %v786_v33 = vmul.f32 %v2611_v37, %v665_v3  ;;  %v2612_v17 = vld [vmem:[#allocation17_spill] sm:$0xff]  ;;  %v2615_v0 = vld [vmem:[#allocation31_spill] sm:$0xff] }
 0x154   :  { %v468_v2 = vpop.f32.mrf.mxu0  ;;  %v1202_v38 = vmul.f32 %v2311_v21, %v702_v19  ;;  %v882_v24 = vmul.f32 %v2612_v17, %v666_v40  ;;  %v671_v39 = vand.u32 2147483647, %v2615_v0  ;;  %v673_v11 = vand.u32 2147483647, %v2617_v42  ;;  %v2619_v1 = vld [vmem:[#allocation21_spill] sm:$0xff] }
 0x155   :  { %v1478_v56 = vpop.eup %1477  ;;  %v800_v8 = vadd.f32 %v784_v61, %v468_v2  ;;  %v2452_v47 = vpop.f32.mrf.mxu1  ;;  %v2613_v2 = vld [vmem:[#allocation14_spill] sm:$0xff]  ;;  %v675_v3 = vand.u32 2147483647, %v2621_v34  ;;  %v2623_v40 = vld [vmem:[#allocation33_spill] sm:$0xff]  ;;  %v664_v37 = vand.u32 2147483647, %v2434_v10 }
 0x156   :  { %v1398_v49 = vadd.f32 -1.0, %v1478_v56  ;;  %v669_v19 = vand.u32 2147483647, %v2613_v2  ;;  %v2614_v56 = vld [vmem:[#allocation29_spill] sm:$0xff] }
 0x157   :  { %v896_v30 = vadd.f32 %v880_v5, %v800_v8  ;;  %v978_v55 = vmul.f32 %v2614_v56, %v667_v28 }
 0x158   :  { %v1166_v53 = vsel %vm1102_vm11, %v1086_v31, %v1398_v49  ;;  %v409_v31 = vpop.f32.mrf.mxu3 }
 0x159   :  { %v2443_v41 = vadd.f32 %v976_v25, %v896_v30  ;;  %v1182_v7 = vmul.f32 %v1166_v53, %v686_v45  ;;  %v2447_v20 = vpop.f32.mrf.mxu2  ;;  %v2616_v45 = vld [vmem:[#allocation10_spill] sm:$0xff] }
 0x15a   :  { %v787_v49 = vmul.f32 %v2616_v45, %v669_v19  ;;  %v2625_v19 = vld [vmem:[#allocation24_spill] sm:$0xff] }
 0x15b   :  { %v2449_v43 = vadd.f32 %v1202_v38, %v1182_v7  ;;  %v2618_v7 = vld [vmem:[#allocation25_spill] sm:$0xff] }
 0x15c   :  { %v471_v23 = vpop.f32.mrf.mxu0  ;;  %v979_v58 = vmul.f32 %v2618_v7, %v671_v39  ;;  %v2627_v39 = vld [vmem:[#allocation15_spill] sm:$0xff] }
 0x15d   :  { %v801_v62 = vadd.f32 %v785_v4, %v471_v23  ;;  %v2462_v51 = vpop.f32.mrf.mxu1  ;;  %v668_v4 = vand.u32 2147483647, %v409_v31  ;;  %v2620_v23 = vld [vmem:[#allocation28_spill] sm:$0xff]  ;;  %v660_v31 = vand.u32 2147483647, %v2411_v27 }
 0x15f   :  { %v897_v59 = vadd.f32 %v881_v13, %v801_v62  ;;  %v1074_v50 = vmul.f32 %v2623_v40, %v668_v4 }
 0x160   :  { %v412_v8 = vpop.f32.mrf.mxu3 }
 0x161   :  { %v993_v57 = vadd.f32 %v977_v16, %v897_v59  ;;  %v2459_v36 = vpop.f32.mrf.mxu2  ;;  %v672_v30 = vand.u32 2147483647, %v412_v8  ;;  %v2622_v16 = vld [vmem:[#allocation23_spill] sm:$0xff]  ;;  %v2626_v8 = vld [vmem:[#allocation37_spill] sm:$0xff] }
 0x162   :  { %v788_v59 = vmul.f32 %v2622_v16, %v673_v11  ;;  %v1073_v0 = vmul.f32 %v2626_v8, %v664_v37 }
 0x163   :  { %v1075_v35 = vmul.f32 %v2620_v23, %v672_v30 }
 0x164   :  { %v474_v6 = vpop.f32.mrf.mxu0 }
 0x165   :  { %v802_v61 = vadd.f32 %v786_v33, %v474_v6  ;;  %v2470_v53 = vpop.f32.mrf.mxu1 }
 0x167   :  { %v898_v5 = vadd.f32 %v882_v24, %v802_v61  ;;  %v2624_v61 = vld [vmem:[#allocation32_spill] sm:$0xff] }
 0x168   :  { %v415_v62 = vpop.f32.mrf.mxu3  ;;  %v980_v2 = vmul.f32 %v2624_v61, %v675_v3 }
 0x169   :  { %v994_v46 = vadd.f32 %v978_v55, %v898_v5  ;;  %v2468_v32 = vpop.f32.mrf.mxu2  ;;  %v676_v33 = vand.u32 2147483647, %v415_v62  ;;  %v656_v5 = vand.u32 2147483647, %v2374_v9 }
 0x16b   :  { %v1090_v24 = vadd.f32 %v1074_v50, %v994_v46  ;;  %v1076_v45 = vmul.f32 %v2627_v39, %v676_v33  ;;  %v2629_v46 = vld [vmem:[#allocation34_spill] sm:$0xff]  ;;  %v705_v39 = vmax.f32 %v2468_v32, 0.0 }
 0x16c   :  { %v477_v25 = vpop.f32.mrf.mxu0  ;;  %v1071_v11 = vmul.f32 %v2629_v46, %v656_v5 }
 0x16d   :  { %v803_v38 = vadd.f32 %v787_v49, %v477_v25  ;;  %v539_v17 = vpop.f32.mrf.mxu1  ;;  %v2628_v25 = vld [vmem:[#allocation30_spill] sm:$0xff]  ;;  %v1135_v30 = vmul.f32 1.442695, %v1090_v24  ;;  %vm1106_vm14 = vcmp.gt.f32.partialorder %v1090_v24, 0.0 }
 0x16e   :  { %v1072_v10 = vmul.f32 %v2628_v25, %v660_v31  ;;  %v1087_v4 = vadd.f32 %v1071_v11, %v2425_v63 }
 0x16f   :  { %v899_v12 = vadd.f32 %v2619_v1, %v803_v38  ;;  %v1089_v38 = vadd.f32 %v1073_v0, %v993_v57 }
 0x170   :  { %v1088_v1 = vadd.f32 %v1072_v10, %v2443_v41  ;;  %v1129_v3 = vmul.f32 1.442695, %v1087_v4  ;;  %vm1103_vm1 = vcmp.gt.f32.partialorder %v1087_v4, 0.0 }
 0x171   :  { %v995_v13 = vadd.f32 %v979_v58, %v899_v12  ;;  %v2478_v29 = vpop.f32.mrf.mxu2  ;;  %v1133_v9 = vmul.f32 1.442695, %v1089_v38  ;;  %vm1105_vm15 = vcmp.gt.f32.partialorder %v1089_v38, 0.0 }
 0x172   :  { %v1131_v23 = vmul.f32 1.442695, %v1088_v1  ;;  %v706_v61 = vmax.f32 %v2478_v29, 0.0  ;;  %vm1104_vm0 = vcmp.gt.f32.partialorder %v1088_v1, 0.0 }
 0x173   :  { %v1091_v18 = vadd.f32 %v1075_v35, %v995_v13 }
 0x174   :  { %v480_v28 = vpop.f32.mrf.mxu0 }
 0x175   :  { %v804_v6 = vadd.f32 %v788_v59, %v480_v28  ;;  %v1137_v55 = vmul.f32 1.442695, %v1091_v18  ;;  %v542_v7 = vpop.f32.mrf.mxu1  ;;  %vm1107_vm12 = vcmp.gt.f32.partialorder %v1091_v18, 0.0 }
 0x176   :  { %v691_v41 = vand.u32 2147483647, %v542_v7  ;;  %v687_v7 = vand.u32 2147483647, %v2452_v47  ;;  %v1550_v47 = vmov 0  }
 0x177   :  { %v900_v56 = vadd.f32 %v2625_v19, %v804_v6  ;;  %1479 = vpow2.f32 %v1137_v55  ;;  %1456 = vset.pattern.permute.xlu1 %v1550_v47  ;;  %1457 = vset.pattern.permute.xlu0 %v1550_v47 }
 0x178   :  { %1481 = vpow2.f32 %v1135_v30  ;;  %v704_v30 = vmax.f32 %v2459_v36, 0.0 }
 0x179   :  { %v996_v49 = vadd.f32 %v980_v2, %v900_v56  ;;  %v607_v27 = vpop.f32.mrf.mxu2  ;;  %v690_v2 = vand.u32 2147483647, %v539_v17 }
 0x17a   :  { %v707_v50 = vmax.f32 %v607_v27, 0.0  ;;  %v1205_v27 = vmul.f32 %v2311_v21, %v705_v39 }
 0x17b   :  { %v1092_v42 = vadd.f32 %v1076_v45, %v996_v49  ;;  %v1206_v49 = vmul.f32 %v2311_v21, %v706_v61 }
 0x17c   :  { %v1207_v56 = vmul.f32 %v2311_v21, %v707_v50 }
 0x17d   :  { %v1139_v58 = vmul.f32 1.442695, %v1092_v42  ;;  %v1480_v12 = vpop.eup %1479  ;;  %v545_v16 = vpop.f32.mrf.mxu1  ;;  %vm1108_vm13 = vcmp.gt.f32.partialorder %v1092_v42, 0.0 }
 0x17e   :  { %v1482_v13 = vpop.eup %1481  ;;  %v1403_v57 = vadd.f32 -1.0, %v1480_v12  ;;  %v692_v59 = vand.u32 2147483647, %v545_v16 }
 0x17f   :  { %1483 = vpow2.f32 %v1139_v58  ;;  %v1402_v37 = vadd.f32 -1.0, %v1482_v13 }
 0x180   :  { %1485 = vpow2.f32 %v1133_v9  ;;  %v1171_v63 = vsel %vm1107_vm12, %v1091_v18, %v1403_v57  ;;  %v689_v18 = vand.u32 2147483647, %v2470_v53  ;;  %v703_v53 = vmax.f32 %v2447_v20, 0.0  ;;  %v1225_v20 = vld [vmem:[#allocation2] sm:$0x1] }
 0x181   :  { %v610_v35 = vpop.f32.mrf.mxu2  ;;  %1487 = vpow2.f32 %v1131_v23  ;;  %v1187_v19 = vmul.f32 %v1171_v63, %v691_v41  ;;  %v1170_v0 = vsel %vm1106_vm14, %v1090_v24, %v1402_v37  ;;  %1228 = vperm.xlu1 %1456, %v1225_v20  }
 0x182   :  { %v708_v62 = vmax.f32 %v610_v35, 0.0  ;;  %1489 = vpow2.f32 %v1129_v3  ;;  %v1186_v45 = vmul.f32 %v1170_v0, %v690_v2 }
 0x183   :  { %v1223_v25 = vadd.f32 %v1207_v56, %v1187_v19 }
 0x184   :  { %v1208_v28 = vmul.f32 %v2311_v21, %v708_v62  ;;  %v1222_v46 = vadd.f32 %v1206_v49, %v1186_v45 }
 0x185   :  { %v1484_v34 = vpop.eup %1483 }
 0x186   :  { %v1404_v40 = vadd.f32 -1.0, %v1484_v34  ;;  %v1486_v6 = vpop.eup %1485 }
 0x187   :  { %v1488_v5 = vpop.eup %1487  ;;  %v1401_v8 = vadd.f32 -1.0, %v1486_v6 }
 0x188   :  { %v1172_v33 = vsel %vm1108_vm13, %v1092_v42, %v1404_v40  ;;  %v1490_v10 = vpop.eup %1489  ;;  %v1400_v29 = vadd.f32 -1.0, %v1488_v5  ;;  %v688_v42 = vand.u32 2147483647, %v2462_v51  ;;  %v1203_v51 = vmul.f32 %v2311_v21, %v703_v53 }
 0x189   :  { %v1188_v31 = vmul.f32 %v1172_v33, %v692_v59  ;;  %v1169_v17 = vsel %vm1105_vm15, %v1089_v38, %v1401_v8  ;;  %v1399_v32 = vadd.f32 -1.0, %v1490_v10  ;;  %v1204_v38 = vmul.f32 %v2311_v21, %v704_v30 }
 0x18a   :  { %v1185_v24 = vmul.f32 %v1169_v17, %v689_v18  ;;  %v1168_v11 = vsel %vm1104_vm0, %v1088_v1, %v1400_v29  ;;  %v1551_v21 = vmov 1.0  }
 0x18b   :  { %v1224_v55 = vadd.f32 %v1208_v28, %v1188_v31  ;;  %v1184_v58 = vmul.f32 %v1168_v11, %v688_v42  ;;  %v1167_v12 = vsel %vm1103_vm1, %v1087_v4, %v1399_v32 }
 0x18c   :  { %v1221_v9 = vadd.f32 %v1205_v27, %v1185_v24  ;;  %v1183_v36 = vmul.f32 %v1167_v12, %v687_v7 }
 0x18d   :  { %1232 = vmatpush.xpose.msra.mxu3 %v1224_v55  ;;  %v1220_v23 = vadd.f32 %v1204_v38, %v1184_v58 }
 0x18e   :  { %v1219_v35 = vadd.f32 %v1203_v51, %v1183_v36 }
 0x191   :  { %1233 = vmatpush.xpose.msra.mxu3 %v1223_v25 }
 0x195   :  { %1234 = vmatpush.xpose.msra.mxu3 %v1222_v46 }
 0x199   :  { %1235 = vmatpush.xpose.msra.mxu3 %v1221_v9 }
 0x19d   :  { %1236 = vmatpush.xpose.msra.mxu3 %v1220_v23 }
 0x1a1   :  { %1237 = vmatpush.xpose.msra.mxu3 %v1219_v35 }
 0x1a5   :  { %1238 = vmatpush.xpose.msra.mxu3 %v2449_v43 }
 0x1a9   :  { %1239 = vmatpush.xpose.msra.mxu3 %v2438_v14 }
 0x1ad   :  { %1240 = vmatpush.xpose.msra.mxu3 %v2414_v48 }
 0x1b1   :  { %1241 = vmatpush.xpose.msra.mxu3 %v2389_v22 }
 0x1b5   :  { %1242 = vmatpush.xpose.msra.mxu3 %v2354_v26 }
 0x1b9   :  { %1243 = vmatpush.xpose.msra.mxu3 %v2359_v44 }
 0x1bd   :  { %1244 = vmatpush.xpose.msra.mxu3 %v2396_v15 }
 0x1c1   :  { %1245 = vmatpush.xpose.msra.mxu3 %v2417_v54 }
 0x1c5   :  { %1246 = vmatpush.xpose.msra.mxu3 %v2432_v52 }
 0x1c9   :  { %1247 = vmatpush.xpose.msra.mxu3 %v2385_v60 }
 0x1cc   :  { %1248 = vmatmul.f32.vlgmr.msra.gmra.mxu3 %v1551_v21 }
 0x1f3   :  { %v1229_v48 = vpop.permute.xlu1 %1228 }
 0x1f4   :  { %v1231_v14 = vperm.slane %v1229_v48, 0 }
 0x24f   :  { %v1249_v26 = vpop.f32.mrf.mxu3 }
 0x250   :  { %v1250_v44 = vadd.f32 %v1249_v26, %v1231_v14 }
 0x252   :  { %1252 = vst [vmem:[#allocation6] sm:$0x1] %v1250_v44 }
 0x253   :  { %1263 = dma.vmem_to_hbm [thread:$0]  %s1259_s27, 16, %s1261_s30, [#allocation5]  }
 0x254   :  { %1541 = dma.done.wait [#allocation5], 16  }
 0x255   :  { %1542 = vsyncadd [#allocation5], 4294967280 }
 0x256   :  { %1268 = vsyncpa [#allocation4], 1 }
 0x257   :  { %1269 = vsyncpa [#allocation5], 1 }

</bundles_post_ra>
